<compile_context>
chip_gen: v5e
topology: v5e:2x2
jax: 0.10.0
libtpu: 0.0.40
codegen_flags: <defaults>
</compile_context>

<pallas_src>
import functools

import jax
import jax.numpy as jnp
from jax import lax
from jax.experimental import pallas as pl
from jax.experimental.pallas import tpu as pltpu

EPS = 1e-5    # nn.BatchNorm2d default
LANE = 128


def _round_up(x, m):
    return -(-x // m) * m


def _vmem_capacity_bytes():
    try:
        return int(pltpu.get_tpu_info().vmem_capacity_bytes)
    except Exception:
        return 64 * 2 ** 20          # assume the smallest generation (v7x) if unknown


def _padded_bytes(shape, itemsize):
    """Conservative VMEM footprint of a block (last dim padded to 128 lanes,
    second-to-last to a full sublane group)."""
    shape = tuple(shape)
    if len(shape) == 1:
        shape = (1,) + shape
    lead = 1
    for d in shape[:-2]:
        lead *= d
    return lead * _round_up(shape[-2], 16) * _round_up(shape[-1], LANE) * itemsize


def _choose_tile_rows(h, w_out, n, *, row_target, min_grid):
    """Largest divisor TH of H with TH*W <= row_target; shrink further (if possible)
    until the (N, H//TH) grid has at least `min_grid` steps (v7x megacore balance)."""
    divs = [d for d in range(1, h + 1) if h % d == 0]
    cands = [d for d in divs if d * w_out <= row_target] or [1]
    th = cands[-1]
    while n * (h // th) < min_grid:
        smaller = [d for d in cands if d < th]
        if not smaller:
            break
        th = smaller[-1]
    return th


def _conv_tile(x_img_ref, w_ref, row0, *, th, w_out, kh, kw):
    """Convolution of one output row block.

    x_img_ref: (Hp, Wp, Cin) bf16   -- whole padded image, resident in VMEM
    w_ref:     (kh*kw*Cin, Cpad) bf16 -- tap-folded weights
    row0:      first output row of this block (== first padded input row needed)
    Returns (TH*W, Cpad) f32.
    """
    cin = x_img_ref.shape[-1]
    xwin = x_img_ref[pl.ds(row0, th + kh - 1), :, :]          # (TH+kh-1, Wp, Cin)
    # Tap folding: build the (TH, W, kh*kw*Cin) im2col patch for this tile with one
    # concat, then a single MXU dot with K = kh*kw*Cin (replaces kh*kw K=Cin dots and
    # the per-tap read-add-write sweeps of a spilled f32 accumulator).
    taps = []
    for i in range(kh):
        for j in range(kw):
            taps.append(xwin[i:i + th, j:j + w_out, :])
    patch = jnp.concatenate(taps, axis=-1).reshape(th * w_out, kh * kw * cin)
    return jnp.dot(patch, w_ref[...], preferred_element_type=jnp.float32)


# ---------------------------------------------------------------------------
# General two-pass path (pass 1: conv + per-tile stats; pass 2: conv + BN + ReLU).
# ---------------------------------------------------------------------------
def _stats_kernel(x_ref, w_ref, stats_ref, *, th, w_out, kh, kw):
    hb = pl.program_id(1)
    row0 = pl.multiple_of(hb * th, th)
    y = _conv_tile(x_ref, w_ref, row0, th=th, w_out=w_out, kh=kh, kw=kw)
    stats_ref[0:1, :] = jnp.sum(y, axis=0, keepdims=True)
    stats_ref[1:2, :] = jnp.sum(y * y, axis=0, keepdims=True)


def _apply_kernel(x_ref, w_ref, scale_ref, shift_ref, o_ref, *, th, w_out, kh, kw, cout):
    hb = pl.program_id(1)
    row0 = pl.multiple_of(hb * th, th)
    y = _conv_tile(x_ref, w_ref, row0, th=th, w_out=w_out, kh=kh, kw=kw)
    y = jnp.maximum(y * scale_ref[...] + shift_ref[...], 0.0)
    # Store only the real Cout channels (no lane-padded f32 slab + XLA slice).
    o_ref[...] = y[:, :cout].reshape(th, w_out, cout).astype(o_ref.dtype)


# ---------------------------------------------------------------------------
# Fused single-kernel fast path (conv output resident in VMEM).
# ---------------------------------------------------------------------------
def _fused_kernel(x_ref, w_ref, gamma_ref, beta_ref, o_ref, acc_ref, *,
                  th, w_out, kh, kw, cout, n_tiles, m_tile, m_total):
    b = pl.program_id(0)
    hb = pl.program_id(1)
    is_first = jnp.logical_and(b == 0, hb == 0)
    is_last = jnp.logical_and(b == pl.num_programs(0) - 1, hb == pl.num_programs(1) - 1)

    @pl.when(is_first)
    def _():
        acc_ref[...] = jnp.zeros_like(acc_ref)

    row0 = pl.multiple_of(hb * th, th)
    y = _conv_tile(x_ref, w_ref, row0, th=th, w_out=w_out, kh=kh, kw=kw)  # (TH*W, Cpad)

    # Per-tile statistics, merged Chan-style at the end (less cancellation than one
    # global E[y^2] - E[y]^2): rows = [sum of tile means, sum of tile means^2, sum M2].
    s = jnp.sum(y, axis=0, keepdims=True)
    sq = jnp.sum(y * y, axis=0, keepdims=True)
    mean_t = s * (1.0 / m_tile)
    acc_ref[0:1, :] += mean_t
    acc_ref[1:2, :] += mean_t * mean_t
    acc_ref[2:3, :] += sq - s * mean_t

    # Stash the raw conv output (real channels only) into the VMEM-resident output.
    o_ref[b, pl.ds(row0, th), :, :] = y[:, :cout].reshape(th, w_out, cout).astype(o_ref.dtype)

    @pl.when(is_last)
    def _():
        mean = acc_ref[0:1, :] * (1.0 / n_tiles)
        m2 = acc_ref[2:3, :] + m_tile * (acc_ref[1:2, :] - n_tiles * mean * mean)
        var = jnp.maximum(m2 * (1.0 / m_total), 0.0)      # biased var (PyTorch norm)
        rinv = lax.rsqrt(var + EPS)
        scale = gamma_ref[...] * rinv                     # (1, Cpad)
        shift = beta_ref[...] - mean * scale
        scale4 = scale[:, :cout].reshape(1, 1, 1, cout)
        shift4 = shift[:, :cout].reshape(1, 1, 1, cout)
        o_ref[...] = jnp.maximum(o_ref[...] * scale4 + shift4, 0.0)


# ---------------------------------------------------------------------------
# Wrapper.
# ---------------------------------------------------------------------------
@functools.partial(jax.jit, static_argnames=("kh", "kw", "pad", "force_two_pass"))
def conv2d_with_bn(x_nchw, weight, gamma, beta, *, kh, kw, pad, force_two_pass=False):
    """Forward of Conv2dWithBN (stride 1, 'same' padding, training-mode batch stats).

    x_nchw: (N, Cin, H, W) f32
    weight: (Cout, Cin, KH, KW)   (nn.Conv2d layout, bias=False)
    gamma, beta: (Cout,)          (BatchNorm2d affine parameters)
    Returns (N, Cout, H, W) f32.
    """
    if kh != 2 * pad + 1 or kw != 2 * pad + 1:
        raise NotImplementedError("only stride-1 'same' convolutions are supported")
    n, cin, h, w = x_nchw.shape
    cout = weight.shape[0]
    cpad = _round_up(cout, LANE)
    hp, wp = h + 2 * pad, w + 2 * pad
    kk = kh * kw * cin

    # Single XLA staging pass: NCHW -> padded NHWC, bf16 for the MXU (no halo stack,
    # no im2col).  TODO(synk): folding this transpose/pad/cast into the kernel's input
    # DMA would need a manual gather from the raw NCHW layout; not worth it here.
    x_p = jnp.pad(jnp.transpose(x_nchw, (0, 2, 3, 1)),
                  ((0, 0), (pad, pad), (pad, pad), (0, 0))).astype(jnp.bfloat16)

    # Tap-folded weights: (kh*kw*Cin, Cpad), K order (i, j, cin) matching the in-kernel
    # patch construction; output channels zero-padded to a full lane group.
    w_flat = jnp.transpose(weight, (2, 3, 1, 0)).reshape(kk, cout)
    w_flat = jnp.pad(w_flat, ((0, 0), (0, cpad - cout))).astype(jnp.bfloat16)

    gamma_p = jnp.pad(gamma.astype(jnp.float32), (0, cpad - cout)).reshape(1, cpad)
    beta_p = jnp.pad(beta.astype(jnp.float32), (0, cpad - cout)).reshape(1, cpad)

    vmem_cap = _vmem_capacity_bytes()
    row_target = 4096 if vmem_cap > 96 * 2 ** 20 else 2048     # v5e/v6e vs v7x

    x_img_bytes = _padded_bytes((hp, wp, cin), 2)               # per-image input block
    w_bytes = _padded_bytes((kk, cpad), 2)

    def tile_bytes(t):                                          # per-tile working values
        return 2 * (_padded_bytes((t * w, kk), 2) + _padded_bytes((t * w, cpad), 4))

    # ------------------- fused single-kernel fast path -------------------
    th_f = _choose_tile_rows(h, w, n, row_target=row_target, min_grid=1)
    out_resident = _padded_bytes((n * h, w, cout), 4)
    fused_bytes = (2 * x_img_bytes + 2 * w_bytes + 2 * out_resident
                   + tile_bytes(th_f) + 4 * _padded_bytes((4, cpad), 4))
    use_fused = (not force_two_pass) and fused_bytes <= int(0.4 * vmem_cap)

    if use_fused:
        nhb = h // th_f
        vmem_limit = int(min(0.8 * vmem_cap, max(32 * 2 ** 20, 2 * fused_bytes)))
        out_nhwc = pl.pallas_call(
            functools.partial(
                _fused_kernel, th=th_f, w_out=w, kh=kh, kw=kw, cout=cout,
                n_tiles=float(n * nhb), m_tile=float(th_f * w),
                m_total=float(n * h * w)),
            out_shape=jax.ShapeDtypeStruct((n, h, w, cout), jnp.float32),
            grid_spec=pltpu.PrefetchScalarGridSpec(
                num_scalar_prefetch=0,
                grid=(n, nhb),
                in_specs=[
                    pl.BlockSpec((None, hp, wp, cin), lambda i, j: (i, 0, 0, 0)),
                    pl.BlockSpec((kk, cpad), lambda i, j: (0, 0)),
                    pl.BlockSpec((1, cpad), lambda i, j: (0, 0)),
                    pl.BlockSpec((1, cpad), lambda i, j: (0, 0)),
                ],
                # Output block == whole array with a fixed index -> stays resident in
                # VMEM across the (sequential) grid; written to HBM once at the end.
                out_specs=pl.BlockSpec((n, h, w, cout), lambda i, j: (0, 0, 0, 0)),
                scratch_shapes=[pltpu.VMEM((4, cpad), jnp.float32)],
            ),
            compiler_params=pltpu.CompilerParams(
                dimension_semantics=("arbitrary", "arbitrary"),
                vmem_limit_bytes=vmem_limit),
        )(x_p, w_flat, gamma_p, beta_p)
        return jnp.transpose(out_nhwc, (0, 3, 1, 2))

    # ------------------------- general two-pass path -------------------------
    th = _choose_tile_rows(h, w, n, row_target=row_target, min_grid=4)
    nhb = h // th
    m_tile = float(th * w)
    m_total = float(n * h * w)
    two_pass_bytes = (2 * x_img_bytes + 2 * w_bytes + tile_bytes(th)
                      + 2 * _padded_bytes((th, w, cout), 4)
                      + 2 * _padded_bytes((2, cpad), 4))
    vmem_limit = int(min(0.8 * vmem_cap, max(32 * 2 ** 20, 2 * two_pass_bytes)))

    stats = pl.pallas_call(
        functools.partial(_stats_kernel, th=th, w_out=w, kh=kh, kw=kw),
        out_shape=jax.ShapeDtypeStruct((n, nhb, 2, cpad), jnp.float32),
        grid_spec=pltpu.PrefetchScalarGridSpec(
            num_scalar_prefetch=0,
            grid=(n, nhb),
            in_specs=[
                pl.BlockSpec((None, hp, wp, cin), lambda i, j: (i, 0, 0, 0)),
                pl.BlockSpec((kk, cpad), lambda i, j: (0, 0)),
            ],
            out_specs=pl.BlockSpec((None, None, 2, cpad), lambda i, j: (i, j, 0, 0)),
        ),
        compiler_params=pltpu.CompilerParams(
            dimension_semantics=("parallel", "parallel"),
            vmem_limit_bytes=vmem_limit),
    )(x_p, w_flat)

    # XLA glue: Chan-style merge of per-tile stats, then fold BN into scale/shift.
    s = stats[:, :, 0, :]
    sq = stats[:, :, 1, :]
    mean_t = s / m_tile
    m2_t = sq - s * mean_t
    mean = jnp.mean(mean_t, axis=(0, 1))
    m2 = jnp.sum(m2_t, axis=(0, 1)) + m_tile * jnp.sum((mean_t - mean) ** 2, axis=(0, 1))
    var = jnp.maximum(m2 / m_total, 0.0)           # biased variance (PyTorch norm)
    rinv = lax.rsqrt(var + EPS)
    scale = (gamma_p[0] * rinv).reshape(1, cpad)
    shift = (beta_p[0] - mean * gamma_p[0] * rinv).reshape(1, cpad)

    out_blocks = pl.pallas_call(
        functools.partial(_apply_kernel, th=th, w_out=w, kh=kh, kw=kw, cout=cout),
        out_shape=jax.ShapeDtypeStruct((n, nhb, th, w, cout), jnp.float32),
        grid_spec=pltpu.PrefetchScalarGridSpec(
            num_scalar_prefetch=0,
            grid=(n, nhb),
            in_specs=[
                pl.BlockSpec((None, hp, wp, cin), lambda i, j: (i, 0, 0, 0)),
                pl.BlockSpec((kk, cpad), lambda i, j: (0, 0)),
                pl.BlockSpec((1, cpad), lambda i, j: (0, 0)),
                pl.BlockSpec((1, cpad), lambda i, j: (0, 0)),
            ],
            out_specs=pl.BlockSpec((None, None, th, w, cout),
                                   lambda i, j: (i, j, 0, 0, 0)),
        ),
        compiler_params=pltpu.CompilerParams(
            dimension_semantics=("parallel", "parallel"),
            vmem_limit_bytes=vmem_limit),
    )(x_p, w_flat, scale, shift)

    out_nhwc = out_blocks.reshape(n, h, w, cout)
    return jnp.transpose(out_nhwc, (0, 3, 1, 2))


def _reference(x_nchw, weight, gamma, beta, pad):
    """Pure-JAX reference (conv -> training-mode BN -> ReLU); inputs quantized to bf16
    (and back) to match the kernel's MXU input dtype."""
    xq = x_nchw.astype(jnp.bfloat16).astype(jnp.float32)
    wq = weight.astype(jnp.bfloat16).astype(jnp.float32)
    y = lax.conv_general_dilated(
        xq, wq, window_strides=(1, 1), padding=((pad, pad), (pad, pad)),
        dimension_numbers=("NCHW", "OIHW", "NCHW"),
        precision=lax.Precision.HIGHEST)
    mean = jnp.mean(y, axis=(0, 2, 3), keepdims=True)
    var = jnp.mean((y - mean) ** 2, axis=(0, 2, 3), keepdims=True)
    y = (y - mean) * lax.rsqrt(var + EPS)
    y = y * gamma.reshape(1, -1, 1, 1) + beta.reshape(1, -1, 1, 1)
    return jnp.maximum(y, 0.0)


if __name__ == "__main__":
    # Shapes consistent with one Conv2dWithBN(in_channels=4, out_channels=8,
    # kernel_size=3, padding=1) stage from Net.make_conv_layers.
    N, CIN, COUT, H, W = 2, 4, 8, 16, 16
    KH = KW = 3
    PAD = 1

    key = jax.random.PRNGKey(0)
    kx, kw_ = jax.random.split(key)
    x = jax.random.normal(kx, (N, CIN, H, W), dtype=jnp.float32)
    weight = 0.1 * jax.random.normal(kw_, (COUT, CIN, KH, KW), dtype=jnp.float32)
    gamma = jnp.ones((COUT,), dtype=jnp.float32)    # BatchNorm2d init: weight = 1
    beta = jnp.zeros((COUT,), dtype=jnp.float32)    # BatchNorm2d init: bias = 0

    ref = _reference(x, weight, gamma, beta, PAD)

    # Fused single-kernel fast path (taken automatically for small problems).
    out_fused = jax.block_until_ready(
        conv2d_with_bn(x, weight, gamma, beta, kh=KH, kw=KW, pad=PAD))
    assert out_fused.shape == (N, COUT, H, W)
    assert jnp.allclose(out_fused, ref, atol=2e-3, rtol=2e-3), "fused path mismatch"

    # General two-pass path (exercised explicitly so both code paths stay validated).
    out_2p = jax.block_until_ready(
        conv2d_with_bn(x, weight, gamma, beta, kh=KH, kw=KW, pad=PAD,
                       force_two_pass=True))
    assert jnp.allclose(out_2p, ref, atol=2e-3, rtol=2e-3), "two-pass path mismatch"

    print("KERNEL_OK")
</pallas_src>

<mosaic_0001>
module attributes {stable_mosaic.version = 11 : i64} {
  func.func @_fused_kernel(%arg0: i32, %arg1: i32, %arg2: memref<1x18x18x4xbf16, #tpu.memory_space<vmem>>, %arg3: memref<36x128xbf16, #tpu.memory_space<vmem>>, %arg4: memref<1x128xf32, #tpu.memory_space<vmem>>, %arg5: memref<1x128xf32, #tpu.memory_space<vmem>>, %arg6: memref<2x16x16x8xf32, #tpu.memory_space<vmem>>, %arg7: memref<4x128xf32, #tpu.memory_space<vmem>>) attributes {dimension_semantics = [#tpu.dimension_semantics<arbitrary>, #tpu.dimension_semantics<arbitrary>], iteration_bounds = array<i64: 2, 1>, scalar_prefetch = 0 : i64, scratch_operands = 1 : i64, tpu.core_type = #tpu.core_type<tc>, window_params = [{transform_indices = @transform_0, window_bounds = array<i64: 1, 18, 18, 4>}, {pipeline_mode = #tpu.pipeline_mode<synchronous>, transform_indices = @transform_1, window_bounds = array<i64: 36, 128>}, {pipeline_mode = #tpu.pipeline_mode<synchronous>, transform_indices = @transform_2, window_bounds = array<i64: 1, 128>}, {pipeline_mode = #tpu.pipeline_mode<synchronous>, transform_indices = @transform_3, window_bounds = array<i64: 1, 128>}, {pipeline_mode = #tpu.pipeline_mode<synchronous>, transform_indices = @transform_4, window_bounds = array<i64: 2, 16, 16, 8>}]} {
    %c0_i32 = arith.constant 0 : i32
    %0 = arith.cmpi eq, %arg0, %c0_i32 : i32
    %c0_i32_0 = arith.constant 0 : i32
    %1 = arith.cmpi eq, %arg1, %c0_i32_0 : i32
    %2 = arith.andi %0, %1 : i1
    %c1_i32 = arith.constant 1 : i32
    %3 = arith.cmpi eq, %arg0, %c1_i32 : i32
    %c0_i32_1 = arith.constant 0 : i32
    %4 = arith.cmpi eq, %arg1, %c0_i32_1 : i32
    %5 = arith.andi %3, %4 : i1
    %6 = arith.extui %2 : i1 to i32
    %c0_i32_2 = arith.constant 0 : i32
    %7 = arith.cmpi ne, %6, %c0_i32_2 : i32
    scf.if %7 {
      %cst_23 = arith.constant 0.000000e+00 : f32
      %54 = vector.broadcast %cst_23 : f32 to vector<4x128xf32>
      %c0_24 = arith.constant 0 : index
      %c0_25 = arith.constant 0 : index
      %55 = vector.load %arg7[%c0_24, %c0_25] : memref<4x128xf32, #tpu.memory_space<vmem>>, vector<4x128xf32>
      tpu.vector_store %arg7[%c0_24, %c0_25], %54 {strides = array<i32>} : memref<4x128xf32, #tpu.memory_space<vmem>>, vector<4x128xf32>,
    } else {
    }
    %c16_i32 = arith.constant 16 : i32
    %8 = arith.muli %arg1, %c16_i32 : i32
    %9 = tpu.assume_multiple %8, 16 : i32
    %c0 = arith.constant 0 : index
    %10 = arith.index_cast %9 : i32 to index
    %c0_3 = arith.constant 0 : index
    %c0_4 = arith.constant 0 : index
    %11 = vector.load %arg2[%c0, %10, %c0_3, %c0_4] : memref<1x18x18x4xbf16, #tpu.memory_space<vmem>>, vector<1x18x18x4xbf16>
    %12 = vector.shape_cast %11 : vector<1x18x18x4xbf16> to vector<18x18x4xbf16>
    %13 = vector.extract_strided_slice %12 {offsets = [0, 0, 0], sizes = [16, 16, 4], strides = [1, 1, 1]} : vector<18x18x4xbf16> to vector<16x16x4xbf16>
    %14 = vector.extract_strided_slice %12 {offsets = [0, 1, 0], sizes = [16, 16, 4], strides = [1, 1, 1]} : vector<18x18x4xbf16> to vector<16x16x4xbf16>
    %15 = vector.extract_strided_slice %12 {offsets = [0, 2, 0], sizes = [16, 16, 4], strides = [1, 1, 1]} : vector<18x18x4xbf16> to vector<16x16x4xbf16>
    %16 = vector.extract_strided_slice %12 {offsets = [1, 0, 0], sizes = [16, 16, 4], strides = [1, 1, 1]} : vector<18x18x4xbf16> to vector<16x16x4xbf16>
    %17 = vector.extract_strided_slice %12 {offsets = [1, 1, 0], sizes = [16, 16, 4], strides = [1, 1, 1]} : vector<18x18x4xbf16> to vector<16x16x4xbf16>
    %18 = vector.extract_strided_slice %12 {offsets = [1, 2, 0], sizes = [16, 16, 4], strides = [1, 1, 1]} : vector<18x18x4xbf16> to vector<16x16x4xbf16>
    %19 = vector.extract_strided_slice %12 {offsets = [2, 0, 0], sizes = [16, 16, 4], strides = [1, 1, 1]} : vector<18x18x4xbf16> to vector<16x16x4xbf16>
    %20 = vector.extract_strided_slice %12 {offsets = [2, 1, 0], sizes = [16, 16, 4], strides = [1, 1, 1]} : vector<18x18x4xbf16> to vector<16x16x4xbf16>
    %21 = vector.extract_strided_slice %12 {offsets = [2, 2, 0], sizes = [16, 16, 4], strides = [1, 1, 1]} : vector<18x18x4xbf16> to vector<16x16x4xbf16>
    %22 = tpu.concatenate %13, %14, %15, %16, %17, %18, %19, %20, %21 in 2 : vector<16x16x4xbf16>, vector<16x16x4xbf16>, vector<16x16x4xbf16>, vector<16x16x4xbf16>, vector<16x16x4xbf16>, vector<16x16x4xbf16>, vector<16x16x4xbf16>, vector<16x16x4xbf16>, vector<16x16x4xbf16> -> vector<16x16x36xbf16>
    %23 = vector.shape_cast %22 : vector<16x16x36xbf16> to vector<256x36xbf16>
    %c0_5 = arith.constant 0 : index
    %c0_6 = arith.constant 0 : index
    %24 = vector.load %arg3[%c0_5, %c0_6] : memref<36x128xbf16, #tpu.memory_space<vmem>>, vector<36x128xbf16>
    %cst = arith.constant dense<0.000000e+00> : vector<256x128xf32>
    %25 = tpu.matmul %23, %24, %cst {dimension_numbers = #tpu.dot_dimension_numbers<[1], [0], [0], [1], [0, 0, 1, 1], [], []>} : vector<256x36xbf16>, vector<36x128xbf16>, vector<256x128xf32> -> vector<256x128xf32>
    %cst_7 = arith.constant dense<0.000000e+00> : vector<128xf32>
    %26 = vector.multi_reduction <add>, %25, %cst_7 [0] : vector<256x128xf32> to vector<128xf32>
    %27 = vector.shape_cast %26 : vector<128xf32> to vector<1x128xf32>
    %28 = arith.mulf %25, %25 : vector<256x128xf32>
    %cst_8 = arith.constant dense<0.000000e+00> : vector<128xf32>
    %29 = vector.multi_reduction <add>, %28, %cst_8 [0] : vector<256x128xf32> to vector<128xf32>
    %30 = vector.shape_cast %29 : vector<128xf32> to vector<1x128xf32>
    %cst_9 = arith.constant 3.906250e-03 : f32
    %31 = vector.broadcast %cst_9 : f32 to vector<1x128xf32>
    %32 = arith.mulf %27, %31 : vector<1x128xf32>
    %c0_10 = arith.constant 0 : index
    %c0_11 = arith.constant 0 : index
    %33 = vector.load %arg7[%c0_10, %c0_11] : memref<4x128xf32, #tpu.memory_space<vmem>>, vector<1x128xf32>
    %34 = arith.addf %33, %32 : vector<1x128xf32>
    %c0_12 = arith.constant 0 : index
    %c0_13 = arith.constant 0 : index
    %35 = vector.load %arg7[%c0_12, %c0_13] : memref<4x128xf32, #tpu.memory_space<vmem>>, vector<1x128xf32>
    tpu.vector_store %arg7[%c0_12, %c0_13], %34 {strides = array<i32>} : memref<4x128xf32, #tpu.memory_space<vmem>>, vector<1x128xf32>,
    %c1 = arith.constant 1 : index
    %c0_14 = arith.constant 0 : index
    %36 = vector.load %arg7[%c1, %c0_14] : memref<4x128xf32, #tpu.memory_space<vmem>>, vector<1x128xf32>
    %37 = arith.mulf %32, %32 : vector<1x128xf32>
    %38 = arith.addf %36, %37 : vector<1x128xf32>
    %c1_15 = arith.constant 1 : index
    %c0_16 = arith.constant 0 : index
    %39 = vector.load %arg7[%c1_15, %c0_16] : memref<4x128xf32, #tpu.memory_space<vmem>>, vector<1x128xf32>
    tpu.vector_store %arg7[%c1_15, %c0_16], %38 {strides = array<i32>} : memref<4x128xf32, #tpu.memory_space<vmem>>, vector<1x128xf32>,
    %c2 = arith.constant 2 : index
    %c0_17 = arith.constant 0 : index
    %40 = vector.load %arg7[%c2, %c0_17] : memref<4x128xf32, #tpu.memory_space<vmem>>, vector<1x128xf32>
    %41 = arith.mulf %27, %32 : vector<1x128xf32>
    %42 = arith.subf %30, %41 : vector<1x128xf32>
    %43 = arith.addf %40, %42 : vector<1x128xf32>
    %c2_18 = arith.constant 2 : index
    %c0_19 = arith.constant 0 : index
    %44 = vector.load %arg7[%c2_18, %c0_19] : memref<4x128xf32, #tpu.memory_space<vmem>>, vector<1x128xf32>
    tpu.vector_store %arg7[%c2_18, %c0_19], %43 {strides = array<i32>} : memref<4x128xf32, #tpu.memory_space<vmem>>, vector<1x128xf32>,
    %45 = vector.extract_strided_slice %25 {offsets = [0, 0], sizes = [256, 8], strides = [1, 1]} : vector<256x128xf32> to vector<256x8xf32>
    %46 = vector.shape_cast %45 : vector<256x8xf32> to vector<16x16x8xf32>
    %47 = arith.index_cast %arg0 : i32 to index
    %48 = arith.index_cast %9 : i32 to index
    %c0_20 = arith.constant 0 : index
    %c0_21 = arith.constant 0 : index
    %49 = vector.load %arg6[%47, %48, %c0_20, %c0_21] : memref<2x16x16x8xf32, #tpu.memory_space<vmem>>, vector<1x16x16x8xf32>
    %50 = vector.shape_cast %49 : vector<1x16x16x8xf32> to vector<16x16x8xf32>
    %51 = vector.shape_cast %46 : vector<16x16x8xf32> to vector<1x16x16x8xf32>
    tpu.vector_store %arg6[%47, %48, %c0_20, %c0_21], %51 {strides = array<i32>} : memref<2x16x16x8xf32, #tpu.memory_space<vmem>>, vector<1x16x16x8xf32>,
    %52 = arith.extui %5 : i1 to i32
    %c0_i32_22 = arith.constant 0 : i32
    %53 = arith.cmpi ne, %52, %c0_i32_22 : i32
    scf.if %53 {
      %c0_23 = arith.constant 0 : index
      %c0_24 = arith.constant 0 : index
      %54 = vector.load %arg7[%c0_23, %c0_24] : memref<4x128xf32, #tpu.memory_space<vmem>>, vector<1x128xf32>
      %cst_25 = arith.constant 5.000000e-01 : f32
      %55 = vector.broadcast %cst_25 : f32 to vector<1x128xf32>
      %56 = arith.mulf %54, %55 : vector<1x128xf32>
      %c2_26 = arith.constant 2 : index
      %c0_27 = arith.constant 0 : index
      %57 = vector.load %arg7[%c2_26, %c0_27] : memref<4x128xf32, #tpu.memory_space<vmem>>, vector<1x128xf32>
      %c1_28 = arith.constant 1 : index
      %c0_29 = arith.constant 0 : index
      %58 = vector.load %arg7[%c1_28, %c0_29] : memref<4x128xf32, #tpu.memory_space<vmem>>, vector<1x128xf32>
      %cst_30 = arith.constant 2.000000e+00 : f32
      %59 = vector.broadcast %cst_30 : f32 to vector<1x128xf32>
      %60 = arith.mulf %59, %56 : vector<1x128xf32>
      %61 = arith.mulf %60, %56 : vector<1x128xf32>
      %62 = arith.subf %58, %61 : vector<1x128xf32>
      %cst_31 = arith.constant 2.560000e+02 : f32
      %63 = vector.broadcast %cst_31 : f32 to vector<1x128xf32>
      %64 = arith.mulf %63, %62 : vector<1x128xf32>
      %65 = arith.addf %57, %64 : vector<1x128xf32>
      %cst_32 = arith.constant 0.001953125 : f32
      %66 = vector.broadcast %cst_32 : f32 to vector<1x128xf32>
      %67 = arith.mulf %65, %66 : vector<1x128xf32>
      %cst_33 = arith.constant 0.000000e+00 : f32
      %68 = vector.broadcast %cst_33 : f32 to vector<1x128xf32>
      %69 = arith.maximumf %67, %68 : vector<1x128xf32>
      %cst_34 = arith.constant 9.99999974E-6 : f32
      %70 = vector.broadcast %cst_34 : f32 to vector<1x128xf32>
      %71 = arith.addf %69, %70 : vector<1x128xf32>
      %72 = math.rsqrt %71 : vector<1x128xf32>
      %c0_35 = arith.constant 0 : index
      %c0_36 = arith.constant 0 : index
      %73 = vector.load %arg4[%c0_35, %c0_36] : memref<1x128xf32, #tpu.memory_space<vmem>>, vector<1x128xf32>
      %74 = arith.mulf %73, %72 : vector<1x128xf32>
      %c0_37 = arith.constant 0 : index
      %c0_38 = arith.constant 0 : index
      %75 = vector.load %arg5[%c0_37, %c0_38] : memref<1x128xf32, #tpu.memory_space<vmem>>, vector<1x128xf32>
      %76 = arith.mulf %56, %74 : vector<1x128xf32>
      %77 = arith.subf %75, %76 : vector<1x128xf32>
      %78 = vector.extract_strided_slice %74 {offsets = [0, 0], sizes = [1, 8], strides = [1, 1]} : vector<1x128xf32> to vector<1x8xf32>
      %79 = vector.shape_cast %78 : vector<1x8xf32> to vector<1x1x1x8xf32>
      %80 = vector.extract_strided_slice %77 {offsets = [0, 0], sizes = [1, 8], strides = [1, 1]} : vector<1x128xf32> to vector<1x8xf32>
      %81 = vector.shape_cast %80 : vector<1x8xf32> to vector<1x1x1x8xf32>
      %c0_39 = arith.constant 0 : index
      %c0_40 = arith.constant 0 : index
      %c0_41 = arith.constant 0 : index
      %c0_42 = arith.constant 0 : index
      %82 = vector.load %arg6[%c0_39, %c0_40, %c0_41, %c0_42] : memref<2x16x16x8xf32, #tpu.memory_space<vmem>>, vector<2x16x16x8xf32>
      %83 = vector.broadcast %79 : vector<1x1x1x8xf32> to vector<2x16x16x8xf32>
      %84 = arith.mulf %82, %83 : vector<2x16x16x8xf32>
      %85 = vector.broadcast %81 : vector<1x1x1x8xf32> to vector<2x16x16x8xf32>
      %86 = arith.addf %84, %85 : vector<2x16x16x8xf32>
      %cst_43 = arith.constant 0.000000e+00 : f32
      %87 = vector.broadcast %cst_43 : f32 to vector<2x16x16x8xf32>
      %88 = arith.maximumf %86, %87 : vector<2x16x16x8xf32>
      %c0_44 = arith.constant 0 : index
      %c0_45 = arith.constant 0 : index
      %c0_46 = arith.constant 0 : index
      %c0_47 = arith.constant 0 : index
      %89 = vector.load %arg6[%c0_44, %c0_45, %c0_46, %c0_47] : memref<2x16x16x8xf32, #tpu.memory_space<vmem>>, vector<2x16x16x8xf32>
      tpu.vector_store %arg6[%c0_44, %c0_45, %c0_46, %c0_47], %88 {strides = array<i32>} : memref<2x16x16x8xf32, #tpu.memory_space<vmem>>, vector<2x16x16x8xf32>,
    } else {
    }
    return
  }
  func.func @transform_0(%arg0: i32, %arg1: i32) -> (i32, i32, i32, i32) {
    %c0_i32 = arith.constant 0 : i32
    %c0_i32_0 = arith.constant 0 : i32
    %c0_i32_1 = arith.constant 0 : i32
    %c0_i32_2 = arith.constant 0 : i32
    return %arg0, %c0_i32, %c0_i32_0, %c0_i32_1 : i32, i32, i32, i32
  }
  func.func @transform_1(%arg0: i32, %arg1: i32) -> (i32, i32) {
    %c0_i32 = arith.constant 0 : i32
    %c0_i32_0 = arith.constant 0 : i32
    %c0_i32_1 = arith.constant 0 : i32
    return %c0_i32, %c0_i32_0 : i32, i32
  }
  func.func @transform_2(%arg0: i32, %arg1: i32) -> (i32, i32) {
    %c0_i32 = arith.constant 0 : i32
    %c0_i32_0 = arith.constant 0 : i32
    %c0_i32_1 = arith.constant 0 : i32
    return %c0_i32, %c0_i32_0 : i32, i32
  }
  func.func @transform_3(%arg0: i32, %arg1: i32) -> (i32, i32) {
    %c0_i32 = arith.constant 0 : i32
    %c0_i32_0 = arith.constant 0 : i32
    %c0_i32_1 = arith.constant 0 : i32
    return %c0_i32, %c0_i32_0 : i32, i32
  }
  func.func @transform_4(%arg0: i32, %arg1: i32) -> (i32, i32, i32, i32) {
    %c0_i32 = arith.constant 0 : i32
    %c0_i32_0 = arith.constant 0 : i32
    %c0_i32_1 = arith.constant 0 : i32
    %c0_i32_2 = arith.constant 0 : i32
    %c0_i32_3 = arith.constant 0 : i32
    return %c0_i32, %c0_i32_0, %c0_i32_1, %c0_i32_2 : i32, i32, i32, i32
  }
}

</mosaic_0001>

<bundles_post_ra>
// kernel: conv2d_with_bn.1
= control target key start
LH: loop header
LB: loop body
LE: loop exit
PB: predicated region body
PF: predicated region fallthrough
CT: control target
= control target key end

     0   :  { %s2131_s15 = smov 0   ;;  %s2133_s16 = smov 0   ;;  %s3667_s0 = inlined_call_operand.vmem [shape: bf16[2,18,18,4], index: 0, kind: input, shape index: {}]   ;;  %s3668_s1 = inlined_call_operand.vmem [shape: bf16[36,128], index: 1, kind: input, shape index: {}]   ;;  %s3669_s2 = inlined_call_operand.vmem [shape: f32[1,128], index: 2, kind: input, shape index: {}]   ;;  %s3670_s3 = inlined_call_operand.vmem [shape: f32[1,128], index: 3, kind: input, shape index: {}]   ;;  %s3671_s4 = inlined_call_operand.vmem [shape: f32[2,16,16,8], index: 4, kind: output, shape index: {}]  }
   0x1   :  { %s2135_s17 = smov 0  }
   0x2 LB: > { %s26_s18 = sadd.s32 1, %s2091_s16  ;;  %p1901_p0 = scmp.ge.s32.totalorder %s2095_s17, 1  ;;  %s2095_s17 = sphi %s2135_s17, %s14_s17   ;;  %s2091_s16 = sphi %s2133_s16, %s3673_s16   ;;  %s2087_s15 = sphi %s2131_s15, %s3672_s15  }
   0x3   : > { %p28_p1 = scmp.ge.s32.totalorder %s26_s18, 2  ;;  %p169_p2 = scmp.lt.s32.totalorder %s2095_s17, 3 }
   0x5   : > { %s3675_s18 = smov (%p28_p1, %s26_s18), 0  ;;  %p170_p3 = pnand %p1901_p0, %p169_p2 }
   0x6   : > { %p190_p4 = scmp.lt.s32.totalorder (!%p170_p3), %s2087_s15, 1  ;;  %p196_p5 = scmp.eq.s32.totalorder (!%p170_p3), %s2087_s15, 0 }
   0x7   : > { %173 = sbr.rel (%p170_p3) target bundleno = 761 (0x2f9), region = 36  ;;  %p200_p6 = scmp.eq.s32.totalorder (!%p170_p3), %s2087_s15, 1 }
   0xc   : > { %s191_s19 = scalar_select %p190_p4, %s2087_s15, 1  ;;  %v2097_v0 = vmov (%p196_p5), 0.0  }
   0xd   : > { %204 = sbr.rel (!%p196_p5) target bundleno = 18 (0x12), region = 40  ;;  %205 = vst [vmem:[#allocation2] sm:$0xf] (%p196_p5), %v2097_v0 }
   0xe   : > { %s2035_s20 = smul.u32 216, %s191_s19 }
  0x10   : > { %s2158_s23 = scalar_lea.vmem %s3667_s0, %s2035_s20 }
  0x12 PF: > { %v2161_v1 = vld [vmem:[%s2158_s23 + $0x30] sm:$0xff]  ;;  %v224_v2 = vld [vmem:[%s2158_s23 + $0x38] sm:$0x1]  ;;  %v218_v5 = vld [vmem:[%s2158_s23 + $0x20] sm:$0x1]  ;;  %s2098_s24 = smov 4  }
  0x13   : > { %v364_v3 = vunpack.c.l.b16 %v224_v2  ;;  %v2165_v4 = vld [vmem:[%s2158_s23 + $0x18] sm:$0xff]  ;;  %v2169_v6 = vld [vmem:[%s2158_s23] sm:$0xff]  ;;  %vm392_vm0 = vsmask.f32 7424  ;;  %v442_v7 = vshrl.u32 %v2161_v1, 16  ;;  %v444_v8 = vshll.u32 %v2161_v1, 16 }
  0x14   : > { %v362_v9 = vunpack.c.l.b16 %v218_v5  ;;  %v212_v10 = vld [vmem:[%s2158_s23 + $0x8] sm:$0x1]  ;;  %v418_v12 = vshrl.u32 %v2165_v4, 16  ;;  %v420_v13 = vshll.u32 %v2165_v4, 16  ;;  %v227_v15 = vld [vmem:[%s2158_s23 + $0x44] sm:$0x1] }
  0x15   : > { %v2174_v11 = vpack.c.b16 %v364_v3, %v364_v3  ;;  %v360_v14 = vunpack.c.l.b16 %v212_v10  ;;  %v446_v16 = vrot.slane %v444_v8, 1  ;;  %v394_v18 = vshrl.u32 %v2169_v6, 16  ;;  %v2184_v20 = vld [vmem:[%s2158_s23 + $0x3c] sm:$0xff]  ;;  %v221_v25 = vld [vmem:[%s2158_s23 + $0x2c] sm:$0x1]  ;;  %v2193_v30 = vld [vmem:[%s2158_s23 + $0x24] sm:$0xff] }
  0x16   : > { %v2179_v17 = vpack.c.b16 %v362_v9, %v362_v9  ;;  %v396_v19 = vshll.u32 %v2169_v6, 16  ;;  %v422_v22 = vrot.slane %v420_v13, 1  ;;  %v365_v24 = vunpack.c.l.b16 %v227_v15  ;;  %v2200_v39 = vld [vmem:[%s2158_s23 + $0xc] sm:$0xff]  ;;  %v215_v40 = vld [vmem:[%s2158_s23 + $0x14] sm:$0x1]  ;;  %v2209_v45 = vld [vmem:[%s2158_s23 + $0x60] sm:$0xff] }
  0x17   : > { %v449_v21 = vshll.u32 %v2174_v11, 16  ;;  %v2187_v23 = vpack.c.b16 %v360_v14, %v360_v14  ;;  %v447_v26 = vor.u32 %v446_v16, %v442_v7  ;;  %v454_v29 = vshrl.u32 %v2184_v20, 16  ;;  %v236_v50 = vld [vmem:[%s2158_s23 + $0x68] sm:$0x1]  ;;  %v2228_v59 = vld [vmem:[%s2158_s23 + $0x54] sm:$0xff]  ;;  %s2099_s25 = smov 8  }
  0x18   : > { %v425_v27 = vshll.u32 %v2179_v17, 16  ;;  %v398_v28 = vrot.slane %v396_v19, 1  ;;  %v423_v32 = vor.u32 %v422_v22, %v418_v12  ;;  %v2196_v34 = vpack.c.b16 %v365_v24, %v365_v24  ;;  %v233_v60 = vld [vmem:[%s2158_s23 + $0x5c] sm:$0x1]  ;;  %v2239_v8 = vld [vmem:[%s2158_s23 + $0x48] sm:$0xff]  ;;  %s2100_s26 = smov 12  }
  0x19   : > { %v451_v31 = vrot.slane %v449_v21, 1  ;;  %v401_v33 = vshll.u32 %v2187_v23, 16  ;;  %v456_v37 = vshll.u32 %v2184_v20, 16  ;;  %v363_v38 = vunpack.c.l.b16 %v221_v25  ;;  %v230_v14 = vld [vmem:[%s2158_s23 + $0x50] sm:$0x1]  ;;  %s2101_s27 = smov 24  }
  0x1a   : > { %v427_v35 = vrot.slane %v425_v27, 1  ;;  %v399_v36 = vor.u32 %v398_v28, %v394_v18  ;;  %v461_v43 = vshll.u32 %v2196_v34, 16  ;;  %v430_v44 = vshrl.u32 %v2193_v30, 16  ;;  %v245_v21 = vld [vmem:[%s2158_s23 + $0x8c] sm:$0x1]  ;;  %v2255_v27 = vld [vmem:[%s2158_s23 + $0x84] sm:$0xff] }
  0x1b   : > { %v2204_v41 = vsel %vm392_vm0, %v447_v26, %v451_v31  ;;  %v403_v42 = vrot.slane %v401_v33, 1  ;;  %v458_v47 = vrot.slane %v456_v37, 1  ;;  %v2216_v48 = vpack.c.b16 %v363_v38, %v363_v38  ;;  %v2268_v38 = vld [vmem:[%s2158_s23 + $0x78] sm:$0xff]  ;;  %s2102_s28 = smov 20   ;;  %s2103_s29 = smov 16  }
  0x1c   : > { %593 = vrot.lane.b32.xlu2 %v2204_v41, %s2098_s24  ;;  %v2214_v46 = vsel %vm392_vm0, %v423_v32, %v427_v35  ;;  %v432_v49 = vshll.u32 %v2193_v30, 16  ;;  %v463_v52 = vrot.slane %v461_v43, 1  ;;  %v361_v53 = vunpack.c.l.b16 %v215_v40  ;;  %v242_v40 = vld [vmem:[%s2158_s23 + $0x80] sm:$0x1]  ;;  %s2104_s30 = smov 32   ;;  %s2105_s5 = smov 28  }
  0x1d   : > { %589 = vrot.lane.b32.xlu1 %v2214_v46, %s2098_s24  ;;  %v404_v51 = vsel %vm392_vm0, %v399_v36, %v403_v42  ;;  %v406_v54 = vshrl.u32 %v2200_v39, 16  ;;  %v459_v55 = vor.u32 %v458_v47, %v454_v29  ;;  %v437_v57 = vshll.u32 %v2216_v48, 16  ;;  %s2001_s12 = sshll.u32 %s2087_s15, 8 }
  0x1e   : > { %585 = vrot.lane.b32.xlu0 %v404_v51, %s2098_s24  ;;  %v434_v56 = vrot.slane %v432_v49, 1  ;;  %v408_v58 = vshll.u32 %v2200_v39, 16  ;;  %v2231_v61 = vpack.c.b16 %v361_v53, %v361_v53  ;;  %v368_v62 = vunpack.c.l.b16 %v236_v50  ;;  %v2283_v53 = vld [vmem:[%s2158_s23 + $0x6c] sm:$0xff]  ;;  %s2860_s19 = scalar_lea.vmem %s3671_s4, %s2001_s12 }
  0x1f   : > { %v490_v63 = vshrl.u32 %v2209_v45, 16  ;;  %v492_v0 = vshll.u32 %v2209_v45, 16  ;;  %v2236_v2 = vsel %vm392_vm0, %v459_v55, %v463_v52  ;;  %v439_v5 = vrot.slane %v437_v57, 1 }
  0x20   : > { %v435_v3 = vor.u32 %v434_v56, %v430_v44  ;;  %v410_v7 = vrot.slane %v408_v58, 1  ;;  %v413_v9 = vshll.u32 %v2231_v61, 16  ;;  %v2242_v10 = vpack.c.b16 %v368_v62, %v368_v62 }
  0x21   : > { %v494_v12 = vrot.slane %v492_v0, 1  ;;  %v367_v13 = vunpack.c.l.b16 %v233_v60  ;;  %v478_v18 = vshrl.u32 %v2228_v59, 16  ;;  %v480_v19 = vshll.u32 %v2228_v59, 16 }
  0x22   : > { %v2246_v15 = vsel %vm392_vm0, %v435_v3, %v439_v5  ;;  %v411_v16 = vor.u32 %v410_v7, %v406_v54  ;;  %v415_v22 = vrot.slane %v413_v9, 1  ;;  %v497_v25 = vshll.u32 %v2242_v10, 16  ;;  %v239_v54 = vld [vmem:[%s2158_s23 + $0x74] sm:$0x1]  ;;  %v254_v3 = vld [vmem:[%s2158_s23 + $0xb0] sm:$0x1] }
  0x23   : > { %v495_v24 = vor.u32 %v494_v12, %v490_v63  ;;  %v2252_v26 = vpack.c.b16 %v367_v13, %v367_v13  ;;  %v482_v28 = vrot.slane %v480_v19, 1  ;;  %v366_v29 = vunpack.c.l.b16 %v230_v14  ;;  %v2298_v13 = vld [vmem:[%s2158_s23 + $0xa8] sm:$0xff] }
  0x24   : > { %595 = vrot.lane.b32.xlu2 %v2236_v2, %s2098_s24  ;;  %v466_v31 = vshrl.u32 %v2239_v8, 16  ;;  %v468_v32 = vshll.u32 %v2239_v8, 16  ;;  %v2264_v33 = vsel %vm392_vm0, %v411_v16, %v415_v22  ;;  %v499_v35 = vrot.slane %v497_v25, 1 }
  0x25   : > { %591 = vrot.lane.b32.xlu1 %v2246_v15, %s2098_s24  ;;  %v485_v36 = vshll.u32 %v2252_v26, 16  ;;  %v371_v37 = vunpack.c.l.b16 %v245_v21  ;;  %v483_v42 = vor.u32 %v482_v28, %v478_v18  ;;  %v2273_v43 = vpack.c.b16 %v366_v29, %v366_v29  ;;  %v2302_v21 = vld [vmem:[%s2158_s23 + $0x9c] sm:$0xff]  ;;  %v251_v29 = vld [vmem:[%s2158_s23 + $0xa4] sm:$0x1] }
  0x26   : > { %587 = vrot.lane.b32.xlu0 %v2264_v33, %s2098_s24  ;;  %v470_v44 = vrot.slane %v468_v32, 1  ;;  %v526_v47 = vshrl.u32 %v2255_v27, 16  ;;  %v2277_v49 = vsel %vm392_vm0, %v495_v24, %v499_v35  ;;  %v528_v52 = vshll.u32 %v2255_v27, 16 }
  0x27   : > { %v487_v50 = vrot.slane %v485_v36, 1  ;;  %v2279_v51 = vpack.c.b16 %v371_v37, %v371_v37  ;;  %v473_v56 = vshll.u32 %v2273_v43, 16  ;;  %v370_v57 = vunpack.c.l.b16 %v242_v40 }
  0x28   : > { %v471_v55 = vor.u32 %v470_v44, %v466_v31  ;;  %v514_v58 = vshrl.u32 %v2268_v38, 16  ;;  %v530_v62 = vrot.slane %v528_v52, 1  ;;  %v516_v0 = vshll.u32 %v2268_v38, 16  ;;  %v248_v44 = vld [vmem:[%s2158_s23 + $0x98] sm:$0x1] }
  0x29   : > { %v2289_v60 = vsel %vm392_vm0, %v483_v42, %v487_v50  ;;  %v533_v63 = vshll.u32 %v2279_v51, 16  ;;  %v475_v5 = vrot.slane %v473_v56, 1  ;;  %v2294_v7 = vpack.c.b16 %v370_v57, %v370_v57  ;;  %v2322_v42 = vld [vmem:[%s2158_s23 + $0x90] sm:$0xff] }
  0x2a   : > { %v369_v9 = vunpack.c.l.b16 %v239_v54  ;;  %v502_v12 = vshrl.u32 %v2283_v53, 16  ;;  %v531_v14 = vor.u32 %v530_v62, %v526_v47  ;;  %v518_v18 = vrot.slane %v516_v0, 1 }
  0x2b   : > { %v535_v16 = vrot.slane %v533_v63, 1  ;;  %v504_v19 = vshll.u32 %v2283_v53, 16  ;;  %v2307_v22 = vsel %vm392_vm0, %v471_v55, %v475_v5  ;;  %v521_v24 = vshll.u32 %v2294_v7, 16 }
  0x2c   : > { %601 = vrot.lane.b32.xlu2 %v2277_v49, %s2098_s24  ;;  %v2310_v25 = vpack.c.b16 %v369_v9, %v369_v9  ;;  %v374_v28 = vunpack.c.l.b16 %v254_v3  ;;  %v519_v31 = vor.u32 %v518_v18, %v514_v58  ;;  %v564_v40 = vshll.u32 %v2298_v13, 16 }
  0x2d   : > { %599 = vrot.lane.b32.xlu1 %v2289_v60, %s2098_s24  ;;  %v506_v32 = vrot.slane %v504_v19, 1  ;;  %v523_v35 = vrot.slane %v521_v24, 1  ;;  %v373_v50 = vunpack.c.l.b16 %v251_v29  ;;  %v552_v52 = vshll.u32 %v2302_v21, 16  ;;  %v2346_v19 = vld [vmem:[%s2158_s23 + $0xb4] sm:$0xff]  ;;  %v257_v24 = vld [vmem:[%s2158_s23 + $0xbc] sm:$0x1] }
  0x2e   : > { %597 = vrot.lane.b32.xlu0 %v2307_v22, %s2098_s24  ;;  %v509_v36 = vshll.u32 %v2310_v25, 16  ;;  %v2318_v37 = vpack.c.b16 %v374_v28, %v374_v28  ;;  %v2327_v54 = vsel %vm392_vm0, %v531_v14, %v535_v16  ;;  %v562_v56 = vshrl.u32 %v2298_v13, 16 }
  0x2f   : > { %v507_v47 = vor.u32 %v506_v32, %v502_v12  ;;  %v566_v57 = vrot.slane %v564_v40, 1  ;;  %v2331_v62 = vpack.c.b16 %v373_v50, %v373_v50  ;;  %v372_v63 = vunpack.c.l.b16 %v248_v44 }
  0x30   : > { %v511_v55 = vrot.slane %v509_v36, 1  ;;  %v569_v58 = vshll.u32 %v2318_v37, 16  ;;  %v2334_v0 = vsel %vm392_vm0, %v519_v31, %v523_v35  ;;  %v550_v3 = vshrl.u32 %v2302_v21, 16 }
  0x31   : > { %v554_v5 = vrot.slane %v552_v52, 1  ;;  %v540_v9 = vshll.u32 %v2322_v42, 16  ;;  %v557_v14 = vshll.u32 %v2331_v62, 16  ;;  %v2342_v16 = vpack.c.b16 %v372_v63, %v372_v63 }
  0x32   : > { %v2339_v12 = vsel %vm392_vm0, %v507_v47, %v511_v55  ;;  %v538_v18 = vshrl.u32 %v2322_v42, 16  ;;  %v567_v29 = vor.u32 %v566_v57, %v562_v56  ;;  %v571_v31 = vrot.slane %v569_v58, 1 }
  0x33   : > { %v542_v28 = vrot.slane %v540_v9, 1  ;;  %v545_v32 = vshll.u32 %v2342_v16, 16  ;;  %v555_v35 = vor.u32 %v554_v5, %v550_v3  ;;  %v559_v36 = vrot.slane %v557_v14, 1 }
  0x34   : > { %607 = vrot.lane.b32.xlu2 %v2327_v54, %s2098_s24  ;;  %v375_v40 = vunpack.c.l.b16 %v257_v24  ;;  %v576_v50 = vshll.u32 %v2346_v19, 16  ;;  %v2360_v55 = vsel %vm392_vm0, %v567_v29, %v571_v31  ;;  %v574_v58 = vshrl.u32 %v2346_v19, 16 }
  0x35   : > { %605 = vrot.lane.b32.xlu1 %v2334_v0, %s2098_s24  ;;  %v543_v44 = vor.u32 %v542_v28, %v538_v18  ;;  %v547_v47 = vrot.slane %v545_v32, 1  ;;  %v2363_v56 = vsel %vm392_vm0, %v555_v35, %v559_v36  ;;  %v621_v5 = vrot.slane %v2200_v39, 1 }
  0x36   : > { %603 = vrot.lane.b32.xlu0 %v2339_v12, %s2098_s24  ;;  %v2357_v52 = vpack.c.b16 %v375_v40, %v375_v40  ;;  %v578_v63 = vrot.slane %v576_v50, 1  ;;  %v622_v9 = vrot.slane %v2231_v61, 1  ;;  %vm617_vm1 = vcmask 1046528  }
  0x37   : > { %v2366_v57 = vsel %vm392_vm0, %v543_v44, %v547_v47  ;;  %v618_v14 = vrot.slane %v2169_v6, 1  ;;  %v619_v18 = vrot.slane %v2187_v23, 1  ;;  %v630_v61 = vrot.slane %v2161_v1, 1 }
  0x38   : > { %v581_v3 = vshll.u32 %v2357_v52, 16  ;;  %v579_v24 = vor.u32 %v578_v63, %v574_v58  ;;  %v623_v29 = vsel %vm617_vm1, %v621_v5, %v622_v9  ;;  %v631_v35 = vrot.slane %v2174_v11, 1 }
  0x39   : > { %v620_v31 = vsel %vm617_vm1, %v618_v14, %v619_v18  ;;  %v627_v23 = vrot.slane %v2193_v30, 1  ;;  %v628_v36 = vrot.slane %v2216_v48, 1  ;;  %v624_v40 = vrot.slane %v2165_v4, 1 }
  0x3a   : > { %v583_v28 = vrot.slane %v581_v3, 1  ;;  %v625_v44 = vrot.slane %v2179_v17, 1  ;;  %v2396_v47 = vsel %vm617_vm1, %v630_v61, %v631_v35  ;;  %v639_v11 = vrot.slane %v2228_v59, 1 }
  0x3b   : > { %v2399_v50 = vsel %vm617_vm1, %v627_v23, %v628_v36  ;;  %v640_v48 = vrot.slane %v2252_v26, 1  ;;  %v636_v17 = vrot.slane %v2239_v8, 1  ;;  %v637_v63 = vrot.slane %v2273_v43, 1 }
  0x3c   : > { %613 = vrot.lane.b32.xlu2 %v2360_v55, %s2098_s24  ;;  %v2383_v32 = vsel %vm392_vm0, %v579_v24, %v583_v28  ;;  %v626_v58 = vsel %vm617_vm1, %v624_v40, %v625_v44  ;;  %v633_v3 = vrot.slane %v2184_v20, 1  ;;  %v634_v5 = vrot.slane %v2196_v34, 1 }
  0x3d   : > { %611 = vrot.lane.b32.xlu1 %v2363_v56, %s2098_s24  ;;  %v2414_v9 = vsel %vm617_vm1, %v639_v11, %v640_v48  ;;  %v2417_v14 = vsel %vm617_vm1, %v636_v17, %v637_v63  ;;  %v648_v26 = vrot.slane %v2268_v38, 1  ;;  %v649_v43 = vrot.slane %v2294_v7, 1 }
  0x3e   : > { %609 = vrot.lane.b32.xlu0 %v2366_v57, %s2098_s24  ;;  %v2420_v18 = vsel %vm617_vm1, %v633_v3, %v634_v5  ;;  %v645_v34 = vrot.slane %v2283_v53, 1  ;;  %v646_v24 = vrot.slane %v2310_v25, 1  ;;  %v642_v28 = vrot.slane %v2209_v45, 1 }
  0x3f   : > { %v2435_v61 = vsel %vm617_vm1, %v648_v26, %v649_v43  ;;  %v655_v7 = vrot.slane %v2342_v16, 1  ;;  %v651_v25 = vrot.slane %v2255_v27, 1  ;;  %v652_v36 = vrot.slane %v2279_v51, 1 }
  0x40   : > { %v2438_v35 = vsel %vm617_vm1, %v645_v34, %v646_v24  ;;  %vm969_vm2 = vcmask 64512   ;;  %vm936_vm3 = vcmask 31744   ;;  %vm1253_vm4 = vcmask 1041408  }
  0x41   : > { %v2457_v44 = vsel %vm617_vm1, %v651_v25, %v652_v36  ;;  %vm1002_vm5 = vcmask 97280   ;;  %vm1035_vm6 = vcmask 130048   ;;  %vm1068_vm7 = vcmask 162816  }
  0x42   : > { %vm1101_vm8 = vcmask 195584   ;;  %vm1134_vm9 = vcmask 228352   ;;  %vm1167_vm10 = vcmask 261120   ;;  %vm1220_vm11 = vcmask 293888  }
  0x44   : > { %668 = vrot.lane.b32.xlu2 %v623_v29, %s2099_s25 }
  0x45   : > { %666 = vrot.lane.b32.xlu1 %v620_v31, %s2099_s25  ;;  %v643_v31 = vrot.slane %v2242_v10, 1  ;;  %v654_v10 = vrot.slane %v2322_v42, 1 }
  0x46   : > { %615 = vrot.lane.b32.xlu0 %v2383_v32, %s2098_s24 }
  0x47   : > { %v2441_v23 = vsel %vm617_vm1, %v642_v28, %v643_v31  ;;  %v2454_v40 = vsel %vm617_vm1, %v654_v10, %v655_v7 }
  0x4c   : > { %674 = vrot.lane.b32.xlu2 %v2396_v47, %s2099_s25 }
  0x4d   : > { %672 = vrot.lane.b32.xlu1 %v2399_v50, %s2099_s25 }
  0x4e   : > { %670 = vrot.lane.b32.xlu0 %v626_v58, %s2099_s25 }
  0x54   : > { %680 = vrot.lane.b32.xlu2 %v2414_v9, %s2099_s25 }
  0x55   : > { %678 = vrot.lane.b32.xlu1 %v2417_v14, %s2099_s25 }
  0x56   : > { %676 = vrot.lane.b32.xlu0 %v2420_v18, %s2099_s25 }
  0x5c   : > { %686 = vrot.lane.b32.xlu2 %v2435_v61, %s2099_s25 }
  0x5d   : > { %684 = vrot.lane.b32.xlu1 %v2438_v35, %s2099_s25 }
  0x5e   : > { %682 = vrot.lane.b32.xlu0 %v2441_v23, %s2099_s25 }
  0x64   : > { %703 = vrot.lane.b32.xlu2 %v2200_v39, %s2100_s26 }
  0x65   : > { %690 = vrot.lane.b32.xlu1 %v2454_v40, %s2099_s25 }
  0x66   : > { %688 = vrot.lane.b32.xlu0 %v2457_v44, %s2099_s25 }
  0x6c   : > { %822 = vrot.lane.b32.xlu2 %v2165_v4, %s2101_s27 }
  0x6d   : > { %785 = vrot.lane.b32.xlu1 %v623_v29, %s2102_s28 }
  0x6e   : > { %750 = vrot.lane.b32.xlu0 %v2264_v33, %s2103_s29 }
  0x74   : > { %705 = vrot.lane.b32.xlu2 %v2165_v4, %s2100_s26 }
  0x75   : > { %904 = vrot.lane.b32.xlu1 %v626_v58, %s2104_s30 }
  0x76   : > { %869 = vrot.lane.b32.xlu0 %v2214_v46, %s2105_s5  ;;  %v594_v51 = vpop.permute.xlu2 %593 }
  0x77   : > { %v946_v34 = vsel %vm936_vm3, %v2161_v1, %v594_v51 }
  0x7c   : > { %758 = vrot.lane.b32.xlu2 %v2236_v2, %s2103_s29 }
  0x7d   : > { %752 = vrot.lane.b32.xlu1 %v2214_v46, %s2103_s29 }
  0x7e   : > { %711 = vrot.lane.b32.xlu0 %v2184_v20, %s2100_s26  ;;  %v2481_v33 = vpop.permute.xlu2 %595 }
  0x84   : > { %824 = vrot.lane.b32.xlu2 %v2193_v30, %s2101_s27 }
  0x85   : > { %793 = vrot.lane.b32.xlu1 %v2420_v18, %s2102_s28 }
  0x86   : > { %787 = vrot.lane.b32.xlu0 %v626_v58, %s2102_s28  ;;  %v2488_v16 = vpop.permute.xlu2 %601 }
  0x8c   : > { %877 = vrot.lane.b32.xlu2 %v2307_v22, %s2105_s5 }
  0x8d   : > { %871 = vrot.lane.b32.xlu1 %v2246_v15, %s2105_s5 }
  0x8e   : > { %830 = vrot.lane.b32.xlu0 %v2239_v8, %s2101_s27  ;;  %v2496_v46 = vpop.permute.xlu2 %607 }
  0x8f   : > { %v590_v29 = vpop.permute.xlu1 %589 }
  0x90   : > { %v2498_v11 = vpop.permute.xlu0 %585 }
  0x94   : > { %719 = vrot.lane.b32.xlu2 %v2283_v53, %s2100_s26 }
  0x95   : > { %912 = vrot.lane.b32.xlu1 %v2417_v14, %s2104_s30 }
  0x96   : > { %906 = vrot.lane.b32.xlu0 %v2399_v50, %s2104_s30  ;;  %v2506_v58 = vpop.permute.xlu2 %613 }
  0x97   : > { %v592_v48 = vpop.permute.xlu1 %591 }
  0x98   : > { %v588_v17 = vpop.permute.xlu0 %587 }
  0x99   : > { %v940_v63 = vsel %vm936_vm3, %v2200_v39, %v588_v17 }
  0x9c   : > { %838 = vrot.lane.b32.xlu2 %v2268_v38, %s2101_s27 }
  0x9d   : > { %801 = vrot.lane.b32.xlu1 %v2438_v35, %s2102_s28 }
  0x9e   : > { %766 = vrot.lane.b32.xlu0 %v2339_v12, %s2103_s29  ;;  %v669_v3 = vpop.permute.xlu2 %668 }
  0x9f   : > { %v600_v5 = vpop.permute.xlu1 %599  ;;  %v2517_v26 = vsel %vm969_vm2, %v940_v63, %v669_v3 }
  0xa0   : > { %v598_v43 = vpop.permute.xlu0 %597  ;;  %v952_v10 = vsel %vm936_vm3, %v2228_v59, %v600_v5  ;;  %v1204_v5 = vld [vmem:[%s3668_s1 + $0x10] sm:$0x3] }
  0xa4   : > { %707 = vrot.lane.b32.xlu2 %v2193_v30, %s2100_s26 }
  0xa5   : > { %920 = vrot.lane.b32.xlu1 %v2435_v61, %s2104_s30 }
  0xa6   : > { %885 = vrot.lane.b32.xlu0 %v2334_v0, %s2105_s5  ;;  %v675_v39 = vpop.permute.xlu2 %674 }
  0xa7   : > { %v606_v24 = vpop.permute.xlu1 %605  ;;  %v2528_v28 = vsel %vm969_vm2, %v946_v34, %v675_v39  ;;  %v1214_v34 = vunpack.c.l.b16 %v1204_v5  ;;  %v944_v39 = vsel %vm936_vm3, %v2193_v30, %v592_v48  ;;  %v2025_v30 = vld [vmem:[%s3668_s1 + $0x8] sm:$0xff]  ;;  %v950_v48 = vsel %vm936_vm3, %v2239_v8, %v598_v43 }
  0xa8   : > { %v2530_v31 = vpop.permute.xlu0 %603  ;;  %v658_v43 = vrot.slane %v2331_v62, 1 }
  0xac   : > { %760 = vrot.lane.b32.xlu2 %v2307_v22, %s2103_s29 }
  0xad   : > { %754 = vrot.lane.b32.xlu1 %v2246_v15, %s2103_s29  ;;  %v958_v15 = vsel %vm936_vm3, %v2268_v38, %v606_v24 }
  0xae   : > { %713 = vrot.lane.b32.xlu0 %v2239_v8, %s2100_s26  ;;  %v681_v7 = vpop.permute.xlu2 %680 }
  0xaf   : > { %v2540_v25 = vpop.permute.xlu1 %611  ;;  %v2543_v36 = vsel %vm969_vm2, %v952_v10, %v681_v7  ;;  %v942_v7 = vsel %vm936_vm3, %v2165_v4, %v590_v29  ;;  %v2024_v29 = vld [vmem:[%s3668_s1] sm:$0xff] }
  0xb0   : > { %v2545_v51 = vpop.permute.xlu0 %609 }
  0xb4   : > { %826 = vrot.lane.b32.xlu2 %v2161_v1, %s2101_s27 }
  0xb5   : > { %795 = vrot.lane.b32.xlu1 %v2417_v14, %s2102_s28 }
  0xb6   : > { %789 = vrot.lane.b32.xlu0 %v2399_v50, %s2102_s28  ;;  %v687_v22 = vpop.permute.xlu2 %686  ;;  %v1217_v50 = vpack.c.b16 %v1214_v34, %v1214_v34 }
  0xb7   : > { %v2556_v17 = vsel %vm969_vm2, %v958_v15, %v687_v22  ;;  %v2558_v63 = vpop.permute.xlu1 %666 }
  0xb8   : > { %v2560_v3 = vpop.permute.xlu0 %615  ;;  %v1255_v10 = vsel %vm1253_vm4, %v1217_v50, 0 }
  0xb9   : > { %1262 = vmatpush.bf16.msra.mxu0 %v1255_v10  ;;  %2026 = vmatpush.bf16.msra.mxu1 %v1255_v10 }
  0xba   : > { %2027 = vmatpush.bf16.msra.mxu2 %v1255_v10  ;;  %2028 = vmatpush.bf16.msra.mxu3 %v1255_v10  ;;  %v956_v10 = vsel %vm936_vm3, %v2283_v53, %v2530_v31 }
  0xbc   : > { %879 = vrot.lane.b32.xlu2 %v2289_v60, %s2105_s5 }
  0xbd   : > { %873 = vrot.lane.b32.xlu1 %v2204_v41, %s2105_s5  ;;  %1263 = vmatpush.bf16.msra.mxu0 %v2025_v30 }
  0xbe   : > { %832 = vrot.lane.b32.xlu0 %v2228_v59, %s2101_s27  ;;  %v2571_v14 = vpop.permute.xlu2 %703  ;;  %2029 = vmatpush.bf16.msra.mxu1 %v2025_v30 }
  0xbf   : > { %v673_v24 = vpop.permute.xlu1 %672  ;;  %2030 = vmatpush.bf16.msra.mxu2 %v2025_v30  ;;  %2031 = vmatpush.bf16.msra.mxu3 %v2025_v30 }
  0xc0   : > { %v2578_v15 = vsel %vm969_vm2, %v944_v39, %v673_v24  ;;  %v671_v22 = vpop.permute.xlu0 %670 }
  0xc1   : > { %v2581_v5 = vsel %vm969_vm2, %v942_v7, %v671_v22  ;;  %1264 = vmatpush.bf16.msra.mxu0 %v2024_v29  ;;  %v954_v22 = vsel %vm936_vm3, %v2209_v45, %v2488_v16  ;;  %v962_v16 = vsel %vm936_vm3, %v2322_v42, %v2545_v51  ;;  %v661_v51 = vrot.slane %v2318_v37, 1 }
  0xc2   : > { %2032 = vmatpush.bf16.msra.mxu1 %v2024_v29 }
  0xc3   : > { %2033 = vmatpush.bf16.msra.mxu2 %v2024_v29  ;;  %2034 = vmatpush.bf16.msra.mxu3 %v2024_v29 }
  0xc4   : > { %721 = vrot.lane.b32.xlu2 %v2268_v38, %s2100_s26  ;;  %v948_v38 = vsel %vm936_vm3, %v2184_v20, %v2481_v33  ;;  %v657_v33 = vrot.slane %v2302_v21, 1 }
  0xc5   : > { %914 = vrot.lane.b32.xlu1 %v2414_v9, %s2104_s30 }
  0xc6   : > { %908 = vrot.lane.b32.xlu0 %v2396_v47, %s2104_s30  ;;  %v2592_v4 = vpop.permute.xlu2 %822 }
  0xc7   : > { %v679_v34 = vpop.permute.xlu1 %678 }
  0xc8   : > { %v2603_v50 = vsel %vm969_vm2, %v950_v48, %v679_v34  ;;  %v677_v39 = vpop.permute.xlu0 %676  ;;  %v2631_v48 = vsel %vm617_vm1, %v657_v33, %v658_v43  ;;  %v960_v34 = vsel %vm936_vm3, %v2255_v27, %v2496_v46  ;;  %v660_v46 = vrot.slane %v2298_v13, 1 }
  0xc9   : > { %v2606_v24 = vsel %vm969_vm2, %v948_v38, %v677_v39  ;;  %v938_v43 = vsel %vm936_vm3, %v2169_v6, %v2498_v11 }
  0xcc   : > { %774 = vrot.lane.b32.xlu2 %v2363_v56, %s2103_s29 }
  0xcd   : > { %768 = vrot.lane.b32.xlu1 %v2334_v0, %s2103_s29 }
  0xce   : > { %727 = vrot.lane.b32.xlu0 %v2302_v21, %s2100_s26  ;;  %v2614_v8 = vpop.permute.xlu2 %705 }
  0xcf   : > { %v685_v7 = vpop.permute.xlu1 %684 }
  0xd0   : > { %v2625_v0 = vsel %vm969_vm2, %v956_v10, %v685_v7  ;;  %v683_v30 = vpop.permute.xlu0 %682  ;;  %v971_v7 = vsel %vm969_vm2, %v938_v43, %v2558_v63 }
  0xd1   : > { %v2628_v29 = vsel %vm969_vm2, %v954_v22, %v683_v30  ;;  %v1004_v30 = vsel %vm1002_vm5, %v971_v7, %v2571_v14 }
  0xd4   : > { %840 = vrot.lane.b32.xlu2 %v2255_v27, %s2101_s27 }
  0xd5   : > { %809 = vrot.lane.b32.xlu1 %v2631_v48, %s2102_s28 }
  0xd6   : > { %803 = vrot.lane.b32.xlu0 %v2435_v61, %s2102_s28  ;;  %v759_v62 = vpop.permute.xlu2 %758 }
  0xd7   : > { %v691_v31 = vpop.permute.xlu1 %690 }
  0xd8   : > { %v2646_v38 = vsel %vm969_vm2, %v962_v16, %v691_v31  ;;  %v689_v39 = vpop.permute.xlu0 %688  ;;  %v2668_v31 = vsel %vm617_vm1, %v660_v46, %v661_v51 }
  0xd9   : > { %v2649_v33 = vsel %vm969_vm2, %v960_v34, %v689_v39 }
  0xdc   : > { %893 = vrot.lane.b32.xlu2 %v2360_v55, %s2105_s5 }
  0xdd   : > { %887 = vrot.lane.b32.xlu1 %v2327_v54, %s2105_s5 }
  0xde   : > { %846 = vrot.lane.b32.xlu0 %v2298_v13, %s2101_s27  ;;  %v825_v61 = vpop.permute.xlu2 %824 }
  0xdf   : > { %v786_v10 = vpop.permute.xlu1 %785 }
  0xe0   : > { %v751_v22 = vpop.permute.xlu0 %750 }
  0xe1   : > { %v1037_v16 = vsel %vm1035_vm6, %v1004_v30, %v751_v22 }
  0xe2   : > { %v1070_v6 = vsel %vm1068_vm7, %v1037_v16, %v786_v10 }
  0xe3   : > { %v1103_v63 = vsel %vm1101_vm8, %v1070_v6, %v2592_v4 }
  0xe4   : > { %709 = vrot.lane.b32.xlu2 %v2161_v1, %s2100_s26 }
  0xe5   : > { %928 = vrot.lane.b32.xlu1 %v2668_v31, %s2104_s30 }
  0xe6   : > { %922 = vrot.lane.b32.xlu0 %v2457_v44, %s2104_s30  ;;  %v878_v37 = vpop.permute.xlu2 %877 }
  0xe7   : > { %v905_v11 = vpop.permute.xlu1 %904 }
  0xe8   : > { %v870_v14 = vpop.permute.xlu0 %869 }
  0xe9   : > { %v1136_v1 = vsel %vm1134_vm9, %v1103_v63, %v870_v14 }
  0xea   : > { %v1169_v34 = vsel %vm1167_vm10, %v1136_v1, %v905_v11 }
  0xeb   : > { %1985 = vmatmul.msk.bf16.vlgmr.msra.gmra.mxu0 %vm1220_vm11, %v1169_v34 }
  0xec   : > { %762 = vrot.lane.b32.xlu2 %v2289_v60, %s2103_s29 }
  0xed   : > { %756 = vrot.lane.b32.xlu1 %v2204_v41, %s2103_s29 }
  0xee   : > { %715 = vrot.lane.b32.xlu0 %v2228_v59, %s2100_s26  ;;  %v720_v39 = vpop.permute.xlu2 %719 }
  0xef   : > { %v753_v46 = vpop.permute.xlu1 %752  ;;  %v1020_v14 = vsel %vm1002_vm5, %v2628_v29, %v720_v39 }
  0xf0   : > { %v712_v4 = vpop.permute.xlu0 %711 }
  0xf4   : > { %828 = vrot.lane.b32.xlu2 %v2184_v20, %s2101_s27  ;;  %v1012_v20 = vsel %vm1002_vm5, %v2528_v28, %v712_v4 }
  0xf5   : > { %797 = vrot.lane.b32.xlu1 %v2414_v9, %s2102_s28  ;;  %v1045_v10 = vsel %vm1035_vm6, %v1012_v20, %v759_v62 }
  0xf6   : > { %791 = vrot.lane.b32.xlu0 %v2396_v47, %s2102_s28  ;;  %v839_v51 = vpop.permute.xlu2 %838  ;;  %v1006_v47 = vsel %vm1002_vm5, %v2517_v26, %v2614_v8 }
  0xf7   : > { %v794_v60 = vpop.permute.xlu1 %793  ;;  %v1039_v7 = vsel %vm1035_vm6, %v1006_v47, %v753_v46 }
  0xf8   : > { %v788_v43 = vpop.permute.xlu0 %787 }
  0xf9   : > { %v1072_v22 = vsel %vm1068_vm7, %v1039_v7, %v788_v43 }
  0xfa   : > { %v1105_v28 = vsel %vm1101_vm8, %v1072_v22, %v825_v61 }
  0xfc   : > { %881 = vrot.lane.b32.xlu2 %v2277_v49, %s2105_s5 }
  0xfd   : > { %875 = vrot.lane.b32.xlu1 %v2236_v2, %s2105_s5  ;;  %v1078_v2 = vsel %vm1068_vm7, %v1045_v10, %v794_v60 }
  0xfe   : > { %834 = vrot.lane.b32.xlu0 %v2209_v45, %s2101_s27  ;;  %v2700_v41 = vpop.permute.xlu2 %707 }
  0xff   : > { %v872_v59 = vpop.permute.xlu1 %871 }
 0x100   : > { %v831_v9 = vpop.permute.xlu0 %830  ;;  %v1138_v16 = vsel %vm1134_vm9, %v1105_v28, %v872_v59 }
 0x101   : > { %v1111_v30 = vsel %vm1101_vm8, %v1078_v2, %v831_v9  ;;  %v1008_v2 = vsel %vm1002_vm5, %v2581_v5, %v2700_v41 }
 0x102   : > { %v1144_v62 = vsel %vm1134_vm9, %v1111_v30, %v878_v37 }
 0x104   : > { %692 = vrot.lane.b32.xlu2 %v2631_v48, %s2099_s25 }
 0x105   : > { %916 = vrot.lane.b32.xlu1 %v2441_v23, %s2104_s30 }
 0x106   : > { %910 = vrot.lane.b32.xlu0 %v2420_v18, %s2104_s30  ;;  %v761_v26 = vpop.permute.xlu2 %760 }
 0x107   : > { %v913_v8 = vpop.permute.xlu1 %912 }
 0x108   : > { %v907_v6 = vpop.permute.xlu0 %906  ;;  %v1177_v11 = vsel %vm1167_vm10, %v1144_v62, %v913_v8 }
 0x109   : > { %v1171_v63 = vsel %vm1167_vm10, %v1138_v16, %v907_v6  ;;  %1989 = vmatmul.msk.bf16.vlgmr.msra.gmra.mxu1 %vm1220_vm11, %v1177_v11  ;;  %v260_v16 = vld [vmem:[%s2158_s23 + $0xc8] sm:$0x1]  ;;  %v2022_v11 = vld [vmem:[%s2158_s23 + $0xc0] sm:$0xff] }
 0x10a   : > { %1986 = vmatmul.msk.bf16.gmra.mxu0 %vm1220_vm11, %v1171_v63  ;;  %v736_v63 = vunpack.c.l.b16 %v260_v16 }
 0x10c   : > { %770 = vrot.lane.b32.xlu2 %v2327_v54, %s2103_s29 }
 0x10d   : > { %729 = vrot.lane.b32.xlu1 %v2298_v13, %s2100_s26 }
 0x10e   : > { %723 = vrot.lane.b32.xlu0 %v2255_v27, %s2100_s26  ;;  %v827_v18 = vpop.permute.xlu2 %826 }
 0x10f   : > { %v802_v61 = vpop.permute.xlu1 %801 }
 0x110   : > { %v767_v37 = vpop.permute.xlu0 %766 }
 0x111   : > { %v1053_v1 = vsel %vm1035_vm6, %v1020_v14, %v767_v37  ;;  %v739_v37 = vshrl.u32 %v2022_v11, 16 }
 0x112   : > { %v1086_v34 = vsel %vm1068_vm7, %v1053_v1, %v802_v61 }
 0x113   : > { %v1119_v54 = vsel %vm1101_vm8, %v1086_v34, %v839_v51 }
 0x114   : > { %811 = vrot.lane.b32.xlu2 %v2668_v31, %s2102_s28 }
 0x115   : > { %805 = vrot.lane.b32.xlu1 %v2457_v44, %s2102_s28  ;;  %v663_v44 = vrot.slane %v2346_v19, 1 }
 0x116   : > { %776 = vrot.lane.b32.xlu0 %v2360_v55, %s2103_s29  ;;  %v880_v27 = vpop.permute.xlu2 %879  ;;  %v664_v55 = vrot.slane %v2357_v52, 1 }
 0x117   : > { %v921_v13 = vpop.permute.xlu1 %920 }
 0x118   : > { %v886_v46 = vpop.permute.xlu0 %885  ;;  %v2756_v43 = vsel %vm617_vm1, %v663_v44, %v664_v55 }
 0x119   : > { %v1152_v29 = vsel %vm1134_vm9, %v1119_v54, %v886_v46 }
 0x11a   : > { %v1185_v39 = vsel %vm1167_vm10, %v1152_v29, %v921_v13 }
 0x11b   : > { %1993 = vmatmul.msk.bf16.vlgmr.msra.gmra.mxu2 %vm1220_vm11, %v1185_v39 }
 0x11c   : > { %889 = vrot.lane.b32.xlu2 %v2366_v57, %s2105_s5 }
 0x11d   : > { %848 = vrot.lane.b32.xlu1 %v2346_v19, %s2101_s27 }
 0x11e   : > { %842 = vrot.lane.b32.xlu0 %v2322_v42, %s2101_s27  ;;  %v2753_v4 = vpop.permute.xlu2 %721 }
 0x11f   : > { %v755_v51 = vpop.permute.xlu1 %754  ;;  %v1022_v54 = vsel %vm1002_vm5, %v2625_v0, %v2753_v4 }
 0x120   : > { %v714_v60 = vpop.permute.xlu0 %713 }
 0x121   : > { %v1014_v47 = vsel %vm1002_vm5, %v2606_v24, %v714_v60  ;;  %v782_v60 = vrot.slane %v2022_v11, 1 }
 0x122   : > { %v1047_v22 = vsel %vm1035_vm6, %v1014_v47, %v761_v26 }
 0x124   : > { %930 = vrot.lane.b32.xlu2 %v2756_v43, %s2104_s30 }
 0x125   : > { %924 = vrot.lane.b32.xlu1 %v2454_v40, %s2104_s30 }
 0x126   : > { %895 = vrot.lane.b32.xlu0 %v2383_v32, %s2105_s5  ;;  %v775_v52 = vpop.permute.xlu2 %774 }
 0x127   : > { %v796_v20 = vpop.permute.xlu1 %795 }
 0x128   : > { %v790_v59 = vpop.permute.xlu0 %789 }
 0x12c   : > { %799 = vrot.lane.b32.xlu2 %v2441_v23, %s2102_s28  ;;  %v1041_v23 = vsel %vm1035_vm6, %v1008_v2, %v755_v51 }
 0x12d   : > { %764 = vrot.lane.b32.xlu1 %v2277_v49, %s2103_s29  ;;  %v1080_v49 = vsel %vm1068_vm7, %v1047_v22, %v796_v20  ;;  %v1074_v30 = vsel %vm1068_vm7, %v1041_v23, %v790_v59 }
 0x12e   : > { %717 = vrot.lane.b32.xlu0 %v2209_v45, %s2100_s26  ;;  %v2770_v9 = vpop.permute.xlu2 %840  ;;  %v1107_v24 = vsel %vm1101_vm8, %v1074_v30, %v827_v18 }
 0x12f   : > { %v874_v10 = vpop.permute.xlu1 %873 }
 0x130   : > { %v833_v7 = vpop.permute.xlu0 %832  ;;  %v1140_v28 = vsel %vm1134_vm9, %v1107_v24, %v874_v10 }
 0x131   : > { %v1113_v45 = vsel %vm1101_vm8, %v1080_v49, %v833_v7  ;;  %v2023_v7 = vld [vmem:[%s2158_s23 + $0xcc] sm:$0xff] }
 0x132   : > { %v1146_v26 = vsel %vm1134_vm9, %v1113_v45, %v880_v27  ;;  %v860_v49 = vshll.u32 %v2023_v7, 16  ;;  %v858_v45 = vshrl.u32 %v2023_v7, 16 }
 0x134   : > { %918 = vrot.lane.b32.xlu2 %v2438_v35, %s2104_s30 }
 0x135   : > { %883 = vrot.lane.b32.xlu1 %v2339_v12, %s2105_s5 }
 0x136   : > { %836 = vrot.lane.b32.xlu0 %v2283_v53, %s2101_s27  ;;  %v894_v5 = vpop.permute.xlu2 %893 }
 0x137   : > { %v915_v41 = vpop.permute.xlu1 %914 }
 0x138   : > { %v909_v8 = vpop.permute.xlu0 %908  ;;  %v1179_v62 = vsel %vm1167_vm10, %v1146_v26, %v915_v41 }
 0x139   : > { %v1173_v35 = vsel %vm1167_vm10, %v1140_v28, %v909_v8  ;;  %1990 = vmatmul.msk.bf16.gmra.mxu1 %vm1220_vm11, %v1179_v62 }
 0x13a   : > { %1987 = vmatmul.msk.bf16.gmra.mxu0 %vm1220_vm11, %v1173_v35 }
 0x13c   : > { %731 = vrot.lane.b32.xlu2 %v2346_v19, %s2100_s26  ;;  %v741_v19 = vshll.u32 %v2022_v11, 16 }
 0x13d   : > { %725 = vrot.lane.b32.xlu1 %v2322_v42, %s2100_s26  ;;  %v737_v42 = vpack.c.b16 %v736_v63, %v736_v63 }
 0x13e   : > { %694 = vrot.lane.b32.xlu0 %v2668_v31, %s2099_s25  ;;  %v2801_v53 = vpop.permute.xlu2 %709  ;;  %v743_v14 = vrot.slane %v741_v19, 1 }
 0x13f   : > { %v769_v12 = vpop.permute.xlu1 %768  ;;  %v746_v1 = vshll.u32 %v737_v42, 16 }
 0x140   : > { %v728_v6 = vpop.permute.xlu0 %727  ;;  %v1055_v39 = vsel %vm1035_vm6, %v1022_v54, %v769_v12 }
 0x144   : > { %807 = vrot.lane.b32.xlu2 %v2454_v40, %s2102_s28  ;;  %v748_v40 = vrot.slane %v746_v1, 1  ;;  %v1010_v1 = vsel %vm1002_vm5, %v2578_v15, %v2801_v53 }
 0x145   : > { %778 = vrot.lane.b32.xlu1 %v2383_v32, %s2103_s29  ;;  %v744_v32 = vor.u32 %v743_v14, %v739_v37 }
 0x146   : > { %772 = vrot.lane.b32.xlu0 %v2366_v57, %s2103_s29  ;;  %v2811_v18 = vpop.permute.xlu2 %762  ;;  %v1028_v57 = vsel %vm1002_vm5, %v2646_v38, %v728_v6 }
 0x147   : > { %v810_v31 = vpop.permute.xlu1 %809  ;;  %v1061_v46 = vsel %vm1035_vm6, %v1028_v57, %v775_v52  ;;  %v749_v29 = vsel %vm392_vm0, %v744_v32, %v748_v40  ;;  %v783_v52 = vrot.slane %v737_v42, 1 }
 0x148   : > { %v804_v61 = vpop.permute.xlu0 %803  ;;  %v1094_v44 = vsel %vm1068_vm7, %v1061_v46, %v810_v31 }
 0x149   : > { %v1088_v55 = vsel %vm1068_vm7, %v1055_v39, %v804_v61 }
 0x14a   : > { %v1121_v0 = vsel %vm1101_vm8, %v1088_v55, %v2770_v9  ;;  %v784_v9 = vsel %vm617_vm1, %v782_v60, %v783_v52 }
 0x14c   : > { %850 = vrot.lane.b32.xlu2 %v2022_v11, %s2101_s27 }
 0x14d   : > { %844 = vrot.lane.b32.xlu1 %v2302_v21, %s2101_s27 }
 0x14e   : > { %813 = vrot.lane.b32.xlu0 %v2756_v43, %s2102_s28  ;;  %v2820_v13 = vpop.permute.xlu2 %828 }
 0x14f   : > { %v888_v34 = vpop.permute.xlu1 %887 }
 0x150   : > { %v847_v27 = vpop.permute.xlu0 %846  ;;  %v1154_v20 = vsel %vm1134_vm9, %v1121_v0, %v888_v34 }
 0x151   : > { %v1127_v38 = vsel %vm1101_vm8, %v1094_v44, %v847_v27 }
 0x152   : > { %v1160_v51 = vsel %vm1134_vm9, %v1127_v38, %v894_v5  ;;  %v862_v5 = vrot.slane %v860_v49, 1 }
 0x154   : > { %926 = vrot.lane.b32.xlu2 %v2631_v48, %s2104_s30  ;;  %v263_v48 = vld [vmem:[%s2158_s23 + $0xd4] sm:$0x1]  ;;  %v863_v8 = vor.u32 %v862_v5, %v858_v45 }
 0x155   : > { %897 = vrot.lane.b32.xlu1 %v749_v29, %s2105_s5  ;;  %v855_v2 = vunpack.c.l.b16 %v263_v48 }
 0x156   : > { %891 = vrot.lane.b32.xlu0 %v2363_v56, %s2105_s5  ;;  %v882_v56 = vpop.permute.xlu2 %881 }
 0x157   : > { %v929_v4 = vpop.permute.xlu1 %928  ;;  %v856_v23 = vpack.c.b16 %v855_v2, %v855_v2 }
 0x158   : > { %v923_v59 = vpop.permute.xlu0 %922  ;;  %v1193_v47 = vsel %vm1167_vm10, %v1160_v51, %v929_v4 }
 0x159   : > { %v1187_v10 = vsel %vm1167_vm10, %v1154_v20, %v923_v59  ;;  %1997 = vmatmul.msk.bf16.vlgmr.msra.gmra.mxu3 %vm1220_vm11, %v1193_v47  ;;  %v865_v24 = vshll.u32 %v856_v23, 16  ;;  %v902_v26 = vrot.slane %v856_v23, 1  ;;  %v964_v23 = vsel %vm936_vm3, %v2302_v21, %v2540_v25 }
 0x15a   : > { %1994 = vmatmul.msk.bf16.gmra.mxu2 %vm1220_vm11, %v1187_v10 }
 0x15b   : > { %v867_v62 = vrot.slane %v865_v24, 1 }
 0x15c   : > { %733 = vrot.lane.b32.xlu2 %v2022_v11, %s2100_s26 }
 0x15d   : > { %696 = vrot.lane.b32.xlu1 %v2756_v43, %s2099_s25  ;;  %v901_v43 = vrot.slane %v2023_v7, 1  ;;  %v868_v6 = vsel %vm392_vm0, %v863_v8, %v867_v62 }
 0x15e   : > { %932 = vrot.lane.b32.xlu0 %v784_v9, %s2104_s30  ;;  %v2853_v41 = vpop.permute.xlu2 %692 }
 0x15f   : > { %v757_v22 = vpop.permute.xlu1 %756  ;;  %v903_v16 = vsel %vm617_vm1, %v901_v43, %v902_v26  ;;  %v997_v49 = vsel %vm969_vm2, %v964_v23, %v2853_v41 }
 0x160   : > { %v716_v30 = vpop.permute.xlu0 %715  ;;  %v1043_v40 = vsel %vm1035_vm6, %v1010_v1, %v757_v22 }
 0x161   : > { %v1016_v63 = vsel %vm1002_vm5, %v2603_v50, %v716_v30 }
 0x162   : > { %v1049_v32 = vsel %vm1035_vm6, %v1016_v63, %v2811_v18 }
 0x164   : > { %852 = vrot.lane.b32.xlu2 %v2023_v7, %s2101_s27 }
 0x165   : > { %815 = vrot.lane.b32.xlu1 %v784_v9, %s2102_s28 }
 0x166   : > { %780 = vrot.lane.b32.xlu0 %v749_v29, %s2103_s29  ;;  %v771_v11 = vpop.permute.xlu2 %770 }
 0x167   : > { %v798_v28 = vpop.permute.xlu1 %797 }
 0x168   : > { %v1266_v35 = vpop.f32.mrf.mxu0  ;;  %v792_v12 = vpop.permute.xlu0 %791  ;;  %v1082_v57 = vsel %vm1068_vm7, %v1049_v32, %v798_v28 }
 0x169   : > { %1469 = vst.msk [vmem:[%s2860_s19] sm:$0xff] %vm969_vm2, %v1266_v35  ;;  %v1383_v61 = vmul.f32 %v1266_v35, %v1266_v35  ;;  %v1076_v34 = vsel %vm1068_vm7, %v1043_v40, %v792_v12 }
 0x16a   : > { %v1109_v54 = vsel %vm1101_vm8, %v1076_v34, %v2820_v13 }
 0x16d   : > { %934 = vrot.lane.b32.xlu1 %v903_v16, %s2104_s30 }
 0x16e   : > { %899 = vrot.lane.b32.xlu0 %v868_v6, %s2105_s5  ;;  %v812_v15 = vpop.permute.xlu2 %811 }
 0x16f   : > { %v876_v42 = vpop.permute.xlu1 %875 }
 0x170   : > { %v1268_v19 = vpop.f32.mrf.mxu0  ;;  %v835_v31 = vpop.permute.xlu0 %834  ;;  %v1142_v53 = vsel %vm1134_vm9, %v1109_v54, %v876_v42 }
 0x171   : > { %v1346_v37 = vadd.f32 %v1268_v19, %v1266_v35  ;;  %v1384_v14 = vmul.f32 %v1268_v19, %v1268_v19  ;;  %1470 = vst.msk [vmem:[%s2860_s19 + $0x8] sm:$0xff] %vm969_vm2, %v1268_v19  ;;  %v1115_v27 = vsel %vm1101_vm8, %v1082_v57, %v835_v31 }
 0x172   : > { %v1148_v29 = vsel %vm1134_vm9, %v1115_v27, %v882_v56 }
 0x173   : > { %v1415_v50 = vadd.f32 %v1384_v14, %v1383_v61 }
 0x176   : > { %v890_v13 = vpop.permute.xlu2 %889 }
 0x177   : > { %v917_v46 = vpop.permute.xlu1 %916 }
 0x178   : > { %v911_v18 = vpop.permute.xlu0 %910  ;;  %v1181_v39 = vsel %vm1167_vm10, %v1148_v29, %v917_v46 }
 0x179   : > { %v1175_v44 = vsel %vm1167_vm10, %v1142_v53, %v911_v18  ;;  %1991 = vmatmul.msk.bf16.gmra.mxu1 %vm1220_vm11, %v1181_v39 }
 0x17a   : > { %1988 = vmatmul.msk.bf16.gmra.mxu0 %vm1220_vm11, %v1175_v44 }
 0x17e   : > { %v931_v47 = vpop.permute.xlu2 %930 }
 0x17f   : > { %v730_v55 = vpop.permute.xlu1 %729 }
 0x180   : > { %v724_v38 = vpop.permute.xlu0 %723  ;;  %v1030_v45 = vsel %vm1002_vm5, %v997_v49, %v730_v55 }
 0x181   : > { %v1024_v10 = vsel %vm1002_vm5, %v2556_v17, %v724_v38 }
 0x182   : > { %v1057_v30 = vsel %vm1035_vm6, %v1024_v10, %v771_v11 }
 0x186   : > { %v2889_v0 = vpop.f32.mrf.mxu1  ;;  %v800_v26 = vpop.permute.xlu2 %799 }
 0x187   : > { %v1271_v4 = vpop.f32.mrf.mxu0  ;;  %1477 = vst.msk [vmem:[%s2860_s19 + $0x40] sm:$0xff] %vm969_vm2, %v2889_v0  ;;  %v806_v51 = vpop.permute.xlu1 %805 }
 0x188   : > { %v1347_v60 = vadd.f32 %v1346_v37, %v1271_v4  ;;  %v1385_v52 = vmul.f32 %v1271_v4, %v1271_v4  ;;  %1471 = vst.msk [vmem:[%s2860_s19 + $0x10] sm:$0xff] %vm969_vm2, %v1271_v4  ;;  %v777_v20 = vpop.permute.xlu0 %776  ;;  %v1090_v5 = vsel %vm1068_vm7, %v1057_v30, %v806_v51 }
 0x189   : > { %v1063_v24 = vsel %vm1035_vm6, %v1030_v45, %v777_v20 }
 0x18a   : > { %v1416_v59 = vadd.f32 %v1415_v50, %v1385_v52  ;;  %v1096_v28 = vsel %vm1068_vm7, %v1063_v24, %v812_v15 }
 0x18e   : > { %v2896_v48 = vpop.f32.mrf.mxu1  ;;  %v919_v11 = vpop.permute.xlu2 %918 }
 0x18f   : > { %v1273_v56 = vpop.f32.mrf.mxu0  ;;  %1478 = vst.msk [vmem:[%s2860_s19 + $0x48] sm:$0xff] %vm969_vm2, %v2896_v48  ;;  %v849_v9 = vpop.permute.xlu1 %848 }
 0x190   : > { %v1348_v7 = vadd.f32 %v1347_v60, %v1273_v56  ;;  %v1386_v2 = vmul.f32 %v1273_v56, %v1273_v56  ;;  %1472 = vst.msk [vmem:[%s2860_s19 + $0x18] sm:$0xff] %vm969_vm2, %v1273_v56  ;;  %v843_v22 = vpop.permute.xlu0 %842  ;;  %v1129_v41 = vsel %vm1101_vm8, %v1096_v28, %v849_v9  ;;  %v2070_v28 = vld [vmem:[%s2158_s23 + $0xb4] sm:$0xff] }
 0x191   : > { %v1123_v43 = vsel %vm1101_vm8, %v1090_v5, %v843_v22 }
 0x192   : > { %v1417_v17 = vadd.f32 %v1416_v59, %v1386_v2  ;;  %v1156_v21 = vsel %vm1134_vm9, %v1123_v43, %v890_v13  ;;  %v2069_v59 = vld [vmem:[%s2158_s23 + $0xa8] sm:$0xff] }
 0x196   : > { %v732_v32 = vpop.permute.xlu2 %731 }
 0x197   : > { %v925_v25 = vpop.permute.xlu1 %924 }
 0x198   : > { %v896_v8 = vpop.permute.xlu0 %895  ;;  %v1189_v62 = vsel %vm1167_vm10, %v1156_v21, %v925_v25  ;;  %v968_v21 = vsel %vm936_vm3, %v2070_v28, %v2560_v3 }
 0x199   : > { %v1162_v35 = vsel %vm1134_vm9, %v1129_v41, %v896_v8  ;;  %1995 = vmatmul.msk.bf16.gmra.mxu2 %vm1220_vm11, %v1189_v62 }
 0x19a   : > { %v1195_v12 = vsel %vm1167_vm10, %v1162_v35, %v931_v47  ;;  %v966_v47 = vsel %vm936_vm3, %v2069_v59, %v2506_v58 }
 0x19b   : > { %1998 = vmatmul.msk.bf16.gmra.mxu3 %vm1220_vm11, %v1195_v12 }
 0x19e   : > { %v2923_v16 = vpop.f32.mrf.mxu2  ;;  %v808_v34 = vpop.permute.xlu2 %807 }
 0x19f   : > { %1485 = vst.msk [vmem:[%s2860_s19 + $0x80] sm:$0xff] %vm969_vm2, %v2923_v16  ;;  %v765_v6 = vpop.permute.xlu1 %764 }
 0x1a0   : > { %v718_v63 = vpop.permute.xlu0 %717 }
 0x1a1   : > { %v1018_v42 = vsel %vm1002_vm5, %v2543_v36, %v718_v63 }
 0x1a2   : > { %v1051_v19 = vsel %vm1035_vm6, %v1018_v42, %v765_v6 }
 0x1a3   : > { %v1084_v37 = vsel %vm1068_vm7, %v1051_v19, %v800_v26 }
 0x1a6   : > { %v2931_v31 = vpop.f32.mrf.mxu2  ;;  %v851_v39 = vpop.permute.xlu2 %850 }
 0x1a7   : > { %1486 = vst.msk [vmem:[%s2860_s19 + $0x88] sm:$0xff] %vm969_vm2, %v2931_v31  ;;  %v884_v61 = vpop.permute.xlu1 %883 }
 0x1a8   : > { %v837_v14 = vpop.permute.xlu0 %836 }
 0x1a9   : > { %v1117_v1 = vsel %vm1101_vm8, %v1084_v37, %v837_v14 }
 0x1aa   : > { %v1150_v40 = vsel %vm1134_vm9, %v1117_v1, %v884_v61 }
 0x1ab   : > { %v1183_v36 = vsel %vm1167_vm10, %v1150_v40, %v919_v11 }
 0x1ac   : > { %1992 = vmatmul.msk.bf16.gmra.mxu1 %vm1220_vm11, %v1183_v36 }
 0x1af   : > { %v726_v57 = vpop.permute.xlu1 %725 }
 0x1b0   : > { %v695_v50 = vpop.permute.xlu0 %694  ;;  %v1026_v52 = vsel %vm1002_vm5, %v2649_v33, %v726_v57 }
 0x1b1   : > { %v999_v10 = vsel %vm969_vm2, %v966_v47, %v695_v50 }
 0x1b2   : > { %v1032_v33 = vsel %vm1002_vm5, %v999_v10, %v732_v32 }
 0x1b6   : > { %v2941_v27 = vpop.f32.mrf.mxu1 }
 0x1b7   : > { %v1276_v54 = vpop.f32.mrf.mxu0  ;;  %1479 = vst.msk [vmem:[%s2860_s19 + $0x50] sm:$0xff] %vm969_vm2, %v2941_v27  ;;  %v779_v46 = vpop.permute.xlu1 %778 }
 0x1b8   : > { %v1349_v29 = vadd.f32 %v1348_v7, %v1276_v54  ;;  %v1387_v15 = vmul.f32 %v1276_v54, %v1276_v54  ;;  %1473 = vst.msk [vmem:[%s2860_s19 + $0x20] sm:$0xff] %vm969_vm2, %v1276_v54  ;;  %v773_v53 = vpop.permute.xlu0 %772  ;;  %v927_v7 = vpop.permute.xlu2 %926  ;;  %v1065_v30 = vsel %vm1035_vm6, %v1032_v33, %v779_v46 }
 0x1b9   : > { %v1059_v20 = vsel %vm1035_vm6, %v1026_v52, %v773_v53 }
 0x1ba   : > { %v1418_v18 = vadd.f32 %v1417_v17, %v1387_v15  ;;  %v1092_v56 = vsel %vm1068_vm7, %v1059_v20, %v808_v34  ;;  %v1391_v15 = vmul.f32 %v2889_v0, %v2889_v0 }
 0x1be   : > { %v2948_v44 = vpop.f32.mrf.mxu1 }
 0x1bf   : > { %v1278_v55 = vpop.f32.mrf.mxu0  ;;  %1480 = vst.msk [vmem:[%s2860_s19 + $0x58] sm:$0xff] %vm969_vm2, %v2948_v44  ;;  %v845_v38 = vpop.permute.xlu1 %844 }
 0x1c0   : > { %v1350_v13 = vadd.f32 %v1349_v29, %v1278_v55  ;;  %v1388_v4 = vmul.f32 %v1278_v55, %v1278_v55  ;;  %1474 = vst.msk [vmem:[%s2860_s19 + $0x28] sm:$0xff] %vm969_vm2, %v1278_v55  ;;  %v814_v51 = vpop.permute.xlu0 %813  ;;  %v1125_v2 = vsel %vm1101_vm8, %v1092_v56, %v845_v38  ;;  %v734_v26 = vpop.permute.xlu2 %733 }
 0x1c1   : > { %v1098_v58 = vsel %vm1068_vm7, %v1065_v30, %v814_v51 }
 0x1c2   : > { %v1419_v60 = vadd.f32 %v1418_v18, %v1388_v4  ;;  %v1131_v17 = vsel %vm1101_vm8, %v1098_v58, %v851_v39  ;;  %v1392_v39 = vmul.f32 %v2896_v48, %v2896_v48 }
 0x1c7   : > { %v898_v9 = vpop.permute.xlu1 %897 }
 0x1c8   : > { %v892_v22 = vpop.permute.xlu0 %891  ;;  %v1164_v5 = vsel %vm1134_vm9, %v1131_v17, %v898_v9  ;;  %v853_v11 = vpop.permute.xlu2 %852 }
 0x1c9   : > { %v1158_v23 = vsel %vm1134_vm9, %v1125_v2, %v892_v22 }
 0x1ca   : > { %v1191_v49 = vsel %vm1167_vm10, %v1158_v23, %v927_v7 }
 0x1cb   : > { %1996 = vmatmul.msk.bf16.gmra.mxu2 %vm1220_vm11, %v1191_v49 }
 0x1cf   : > { %v697_v45 = vpop.permute.xlu1 %696 }
 0x1d0   : > { %v933_v24 = vpop.permute.xlu0 %932  ;;  %v1001_v25 = vsel %vm969_vm2, %v968_v21, %v697_v45 }
 0x1d1   : > { %v1197_v43 = vsel %vm1167_vm10, %v1164_v5, %v933_v24  ;;  %v1034_v62 = vsel %vm1002_vm5, %v1001_v25, %v734_v26  ;;  %v1399_v5 = vmul.f32 %v2923_v16, %v2923_v16  ;;  %v1400_v26 = vmul.f32 %v2931_v31, %v2931_v31 }
 0x1d2   : > { %1999 = vmatmul.msk.bf16.gmra.mxu3 %vm1220_vm11, %v1197_v43 }
 0x1d7   : > { %v816_v41 = vpop.permute.xlu1 %815 }
 0x1d8   : > { %v781_v8 = vpop.permute.xlu0 %780 }
 0x1d9   : > { %v1067_v35 = vsel %vm1035_vm6, %v1034_v62, %v781_v8 }
 0x1da   : > { %v1100_v6 = vsel %vm1068_vm7, %v1067_v35, %v816_v41 }
 0x1db   : > { %v1133_v42 = vsel %vm1101_vm8, %v1100_v6, %v853_v11 }
 0x1dc   : > { %v2980_v12 = vpop.f32.mrf.mxu3 }
 0x1dd   : > { %v2983_v63 = vpop.f32.mrf.mxu2  ;;  %1493 = vst.msk [vmem:[%s2860_s19 + $0xc0] sm:$0xff] %vm969_vm2, %v2980_v12 }
 0x1de   : > { %1487 = vst.msk [vmem:[%s2860_s19 + $0x90] sm:$0xff] %vm969_vm2, %v2983_v63  ;;  %v1401_v25 = vmul.f32 %v2983_v63, %v2983_v63 }
 0x1df   : > { %v935_v3 = vpop.permute.xlu1 %934 }
 0x1e0   : > { %v900_v19 = vpop.permute.xlu0 %899 }
 0x1e1   : > { %v1166_v61 = vsel %vm1134_vm9, %v1133_v42, %v900_v19 }
 0x1e2   : > { %v1199_v37 = vsel %vm1167_vm10, %v1166_v61, %v935_v3 }
 0x1e3   : > { %2000 = vmatmul.msk.bf16.gmra.mxu3 %vm1220_vm11, %v1199_v37 }
 0x1e4   : > { %v2995_v14 = vpop.f32.mrf.mxu3 }
 0x1e5   : > { %v2997_v1 = vpop.f32.mrf.mxu2  ;;  %1494 = vst.msk [vmem:[%s2860_s19 + $0xc8] sm:$0xff] %vm969_vm2, %v2995_v14 }
 0x1e6   : > { %1488 = vst.msk [vmem:[%s2860_s19 + $0x98] sm:$0xff] %vm969_vm2, %v2997_v1  ;;  %v1402_v62 = vmul.f32 %v2997_v1, %v2997_v1 }
 0x1f6   : > { %v1296_v32 = vpop.f32.mrf.mxu1 }
 0x1f7   : > { %v1281_v40 = vpop.f32.mrf.mxu0  ;;  %1481 = vst.msk [vmem:[%s2860_s19 + $0x60] sm:$0xff] %vm969_vm2, %v1296_v32  ;;  %v1395_v20 = vmul.f32 %v1296_v32, %v1296_v32 }
 0x1f8   : > { %v1351_v36 = vadd.f32 %v1350_v13, %v1281_v40  ;;  %v1389_v57 = vmul.f32 %v1281_v40, %v1281_v40  ;;  %1475 = vst.msk [vmem:[%s2860_s19 + $0x30] sm:$0xff] %vm969_vm2, %v1281_v40  ;;  %v1393_v13 = vmul.f32 %v2941_v27, %v2941_v27 }
 0x1fa   : > { %v1420_v50 = vadd.f32 %v1419_v60, %v1389_v57  ;;  %v1394_v60 = vmul.f32 %v2948_v44, %v2948_v44 }
 0x1fe   : > { %v1298_v34 = vpop.f32.mrf.mxu1 }
 0x1ff   : > { %v1283_v54 = vpop.f32.mrf.mxu0  ;;  %1482 = vst.msk [vmem:[%s2860_s19 + $0x68] sm:$0xff] %vm969_vm2, %v1298_v34  ;;  %v1396_v10 = vmul.f32 %v1298_v34, %v1298_v34 }
 0x200   : > { %v1352_v46 = vadd.f32 %v1351_v36, %v1283_v54  ;;  %v1390_v29 = vmul.f32 %v1283_v54, %v1283_v54  ;;  %1476 = vst.msk [vmem:[%s2860_s19 + $0x38] sm:$0xff] %vm969_vm2, %v1283_v54 }
 0x202   : > { %v1353_v53 = vadd.f32 %v1352_v46, %v2889_v0  ;;  %v1421_v18 = vadd.f32 %v1420_v50, %v1390_v29  ;;  %v1407_v50 = vmul.f32 %v2980_v12, %v2980_v12  ;;  %v1408_v46 = vmul.f32 %v2995_v14, %v2995_v14 }
 0x204   : > { %v1354_v55 = vadd.f32 %v1353_v53, %v2896_v48  ;;  %v1422_v38 = vadd.f32 %v1421_v18, %v1391_v15 }
 0x206   : > { %v1355_v4 = vadd.f32 %v1354_v55, %v2941_v27  ;;  %v1423_v51 = vadd.f32 %v1422_v38, %v1392_v39 }
 0x208   : > { %v1424_v0 = vadd.f32 %v1423_v51, %v1393_v13  ;;  %v1356_v52 = vadd.f32 %v1355_v4, %v2948_v44 }
 0x20a   : > { %v1357_v48 = vadd.f32 %v1356_v52, %v1296_v32  ;;  %v1425_v59 = vadd.f32 %v1424_v0, %v1394_v60 }
 0x20c   : > { %v1358_v47 = vadd.f32 %v1357_v48, %v1298_v34  ;;  %v1426_v56 = vadd.f32 %v1425_v59, %v1395_v20 }
 0x20e   : > { %v1427_v9 = vadd.f32 %v1426_v56, %v1396_v10 }
 0x21c   : > { %v1316_v7 = vpop.f32.mrf.mxu2 }
 0x21d   : > { %1489 = vst.msk [vmem:[%s2860_s19 + $0xa0] sm:$0xff] %vm969_vm2, %v1316_v7  ;;  %v1403_v11 = vmul.f32 %v1316_v7, %v1316_v7 }
 0x21e   : > { %v1331_v27 = vpop.f32.mrf.mxu3 }
 0x21f   : > { %1495 = vst.msk [vmem:[%s2860_s19 + $0xd0] sm:$0xff] %vm969_vm2, %v1331_v27  ;;  %v1409_v53 = vmul.f32 %v1331_v27, %v1331_v27 }
 0x224   : > { %v1318_v2 = vpop.f32.mrf.mxu2 }
 0x225   : > { %1490 = vst.msk [vmem:[%s2860_s19 + $0xa8] sm:$0xff] %vm969_vm2, %v1318_v2  ;;  %v1404_v42 = vmul.f32 %v1318_v2, %v1318_v2 }
 0x226   : > { %v1333_v22 = vpop.f32.mrf.mxu3 }
 0x227   : > { %1496 = vst.msk [vmem:[%s2860_s19 + $0xd8] sm:$0xff] %vm969_vm2, %v1333_v22  ;;  %v1410_v38 = vmul.f32 %v1333_v22, %v1333_v22 }
 0x229   : > { %v1301_v44 = vpop.f32.mrf.mxu1 }
 0x22a   : > { %1483 = vst.msk [vmem:[%s2860_s19 + $0x70] sm:$0xff] %vm969_vm2, %v1301_v44  ;;  %v1397_v33 = vmul.f32 %v1301_v44, %v1301_v44  ;;  %v1359_v49 = vadd.f32 %v1358_v47, %v1301_v44 }
 0x22c   : > { %v1428_v58 = vadd.f32 %v1427_v9, %v1397_v33 }
 0x231   : > { %v1303_v23 = vpop.f32.mrf.mxu1 }
 0x232   : > { %1484 = vst.msk [vmem:[%s2860_s19 + $0x78] sm:$0xff] %vm969_vm2, %v1303_v23  ;;  %v1398_v30 = vmul.f32 %v1303_v23, %v1303_v23  ;;  %v1360_v17 = vadd.f32 %v1359_v49, %v1303_v23 }
 0x234   : > { %v1429_v45 = vadd.f32 %v1428_v58, %v1398_v30  ;;  %v1361_v24 = vadd.f32 %v1360_v17, %v2923_v16 }
 0x236   : > { %v1430_v43 = vadd.f32 %v1429_v45, %v1399_v5  ;;  %v1362_v28 = vadd.f32 %v1361_v24, %v2931_v31  ;;  %v1453_v24 = vld [vmem:[#allocation2] sm:$0x1] }
 0x238   : > { %v1431_v21 = vadd.f32 %v1430_v43, %v1400_v26  ;;  %v1363_v41 = vadd.f32 %v1362_v28, %v2983_v63  ;;  %v1456_v26 = vld [vmem:[#allocation2 + $0x1] sm:$0x1] }
 0x23a   : > { %v1432_v8 = vadd.f32 %v1431_v21, %v1401_v25  ;;  %v1364_v35 = vadd.f32 %v1363_v41, %v2997_v1 }
 0x23c   : > { %v1433_v16 = vadd.f32 %v1432_v8, %v1402_v62  ;;  %v1365_v3 = vadd.f32 %v1364_v35, %v1316_v7  ;;  %v1460_v8 = vld [vmem:[#allocation2 + $0x2] sm:$0x1] }
 0x23e   : > { %v1434_v31 = vadd.f32 %v1433_v16, %v1403_v11  ;;  %v1366_v19 = vadd.f32 %v1365_v3, %v1318_v2 }
 0x240   : > { %v1435_v63 = vadd.f32 %v1434_v31, %v1404_v42 }
 0x24e   : > { %v1321_v6 = vpop.f32.mrf.mxu2 }
 0x24f   : > { %1491 = vst.msk [vmem:[%s2860_s19 + $0xb0] sm:$0xff] %vm969_vm2, %v1321_v6  ;;  %v1405_v61 = vmul.f32 %v1321_v6, %v1321_v6  ;;  %v1367_v37 = vadd.f32 %v1366_v19, %v1321_v6 }
 0x251   : > { %v1436_v36 = vadd.f32 %v1435_v63, %v1405_v61 }
 0x255   : > { %v1336_v32 = vpop.f32.mrf.mxu3 }
 0x256   : > { %1497 = vst.msk [vmem:[%s2860_s19 + $0xe0] sm:$0xff] %vm969_vm2, %v1336_v32  ;;  %v1323_v40 = vpop.f32.mrf.mxu2  ;;  %v1411_v60 = vmul.f32 %v1336_v32, %v1336_v32 }
 0x257   : > { %v1368_v1 = vadd.f32 %v1367_v37, %v1323_v40  ;;  %v1406_v57 = vmul.f32 %v1323_v40, %v1323_v40  ;;  %1492 = vst.msk [vmem:[%s2860_s19 + $0xb8] sm:$0xff] %vm969_vm2, %v1323_v40 }
 0x259   : > { %v1369_v34 = vadd.f32 %v1368_v1, %v2980_v12  ;;  %v1437_v54 = vadd.f32 %v1436_v36, %v1406_v57 }
 0x25b   : > { %v1370_v29 = vadd.f32 %v1369_v34, %v2995_v14  ;;  %v1438_v15 = vadd.f32 %v1437_v54, %v1407_v50 }
 0x25d   : > { %v1371_v18 = vadd.f32 %v1370_v29, %v1331_v27  ;;  %v1439_v39 = vadd.f32 %v1438_v15, %v1408_v46  ;;  %v1338_v55 = vpop.f32.mrf.mxu3  ;;  %v1525_v29 = vld [vmem:[%s3669_s2] sm:$0x1] (%p200_p6) }
 0x25e   : > { %1498 = vst.msk [vmem:[%s2860_s19 + $0xe8] sm:$0xff] %vm969_vm2, %v1338_v55  ;;  %v1412_v14 = vmul.f32 %v1338_v55, %v1338_v55 }
 0x25f   : > { %v1440_v13 = vadd.f32 %v1439_v39, %v1409_v53  ;;  %v1372_v4 = vadd.f32 %v1371_v18, %v1333_v22  ;;  %v1527_v18 = vld [vmem:[%s3670_s3] sm:$0x1] (%p200_p6) }
 0x261   : > { %v1441_v51 = vadd.f32 %v1440_v13, %v1410_v38  ;;  %v1373_v0 = vadd.f32 %v1372_v4, %v1336_v32 }
 0x263   : > { %v1442_v52 = vadd.f32 %v1441_v51, %v1411_v60  ;;  %v1374_v20 = vadd.f32 %v1373_v0, %v1338_v55 }
 0x265   : > { %v1443_v59 = vadd.f32 %v1442_v52, %v1412_v14 }
 0x266   : > { %v1341_v12 = vpop.f32.mrf.mxu3 }
 0x267   : > { %1499 = vst.msk [vmem:[%s2860_s19 + $0xf0] sm:$0xff] %vm969_vm2, %v1341_v12  ;;  %v1413_v48 = vmul.f32 %v1341_v12, %v1341_v12  ;;  %v1375_v47 = vadd.f32 %v1374_v20, %v1341_v12 }
 0x269   : > { %v1444_v56 = vadd.f32 %v1443_v59, %v1413_v48 }
 0x26e   : > { %v1343_v10 = vpop.f32.mrf.mxu3 }
 0x26f   : > { %v1376_v9 = vadd.f32 %v1375_v47, %v1343_v10  ;;  %v1414_v7 = vmul.f32 %v1343_v10, %v1343_v10  ;;  %1500 = vst.msk [vmem:[%s2860_s19 + $0xf8] sm:$0xff] %vm969_vm2, %v1343_v10 }
 0x271   : > { %v1377_v27 = vrot.slane %v1376_v9, 4  ;;  %v1445_v2 = vadd.f32 %v1444_v56, %v1414_v7 }
 0x273   : > { %v1378_v22 = vadd.f32 %v1377_v27, %v1376_v9  ;;  %v1446_v44 = vrot.slane %v1445_v2, 4 }
 0x275   : > { %v1379_v23 = vrot.slane %v1378_v22, 2  ;;  %v1447_v33 = vadd.f32 %v1446_v44, %v1445_v2 }
 0x276   : > { %v1530_v39 = vld [vmem:[%s3671_s4] sm:$0xff] (%p200_p6)  ;;  %v1531_v55 = vld [vmem:[%s3671_s4 + $0x8] sm:$0xff] (%p200_p6)  ;;  %v1532_v38 = vld [vmem:[%s3671_s4 + $0x10] sm:$0xff] (%p200_p6) }
 0x277   : > { %v1380_v49 = vadd.f32 %v1379_v23, %v1378_v22  ;;  %v1448_v30 = vrot.slane %v1447_v33, 2  ;;  %v1533_v51 = vld [vmem:[%s3671_s4 + $0x18] sm:$0xff] (%p200_p6)  ;;  %v1534_v12 = vld [vmem:[%s3671_s4 + $0x20] sm:$0xff] (%p200_p6)  ;;  %v1535_v60 = vld [vmem:[%s3671_s4 + $0x28] sm:$0xff] (%p200_p6) }
 0x278   : > { %v1536_v0 = vld [vmem:[%s3671_s4 + $0x30] sm:$0xff] (%p200_p6)  ;;  %v1537_v59 = vld [vmem:[%s3671_s4 + $0x38] sm:$0xff] (%p200_p6)  ;;  %v1538_v47 = vld [vmem:[%s3671_s4 + $0x40] sm:$0xff] (%p200_p6) }
 0x279   : > { %v1381_v58 = vrot.slane %v1380_v49, 1  ;;  %v1449_v17 = vadd.f32 %v1448_v30, %v1447_v33  ;;  %v1539_v2 = vld [vmem:[%s3671_s4 + $0x48] sm:$0xff] (%p200_p6)  ;;  %v1540_v22 = vld [vmem:[%s3671_s4 + $0x50] sm:$0xff] (%p200_p6) }
 0x27b   : > { %v1382_v45 = vadd.f32 %v1381_v58, %v1380_v49  ;;  %v1450_v5 = vrot.slane %v1449_v17, 1 }
 0x27d   : > { %v1452_v43 = vmul.f32 0.00390625, %v1382_v45  ;;  %v1451_v28 = vadd.f32 %v1450_v5, %v1449_v17  ;;  %v1541_v17 = vld [vmem:[%s3671_s4 + $0x58] sm:$0xff] (%p200_p6) }
 0x27f   : > { %v1454_v21 = vadd.f32 %v1453_v24, %v1452_v43  ;;  %v1457_v25 = vmul.f32 %v1452_v43, %v1452_v43  ;;  %v1461_v41 = vmul.f32 %v1452_v43, %v1382_v45 }
 0x281   : > { %1455 = vst [vmem:[#allocation2] sm:$0x1] %v1454_v21  ;;  %v1458_v62 = vadd.f32 %v1457_v25, %v1456_v26  ;;  %v1462_v35 = vsub.f32 %v1451_v28, %v1461_v41  ;;  %1502 = sbr.rel (!%p200_p6) target bundleno = 761 (0x2f9), region = 44  ;;  %v1542_v26 = vld [vmem:[%s3671_s4 + $0x60] sm:$0xff] (%p200_p6) }
 0x283   : > { %1459 = vst [vmem:[#allocation2 + $0x1] sm:$0x1] %v1458_v62  ;;  %v1463_v16 = vadd.f32 %v1462_v35, %v1460_v8  ;;  %v1543_v8 = vld [vmem:[%s3671_s4 + $0x68] sm:$0xff] (%p200_p6) }
 0x285   : > { %1464 = vst [vmem:[#allocation2 + $0x2] sm:$0x1] %v1463_v16 }
 0x288   : > { %v1503_v6 = vld [vmem:[#allocation2] sm:$0x1] }
 0x289   : > { %v1504_v11 = vmul.f32 0.5, %v1503_v6  ;;  %v1544_v6 = vld [vmem:[%s3671_s4 + $0x70] sm:$0xff] }
 0x28a   : > { %v1506_v31 = vld [vmem:[#allocation2 + $0x1] sm:$0x1] }
 0x28b   : > { %v1507_v3 = vmul.f32 2.0, %v1504_v11 }
 0x28c   : > { %v1505_v61 = vld [vmem:[#allocation2 + $0x2] sm:$0x1] }
 0x28d   : > { %v1508_v42 = vmul.f32 %v1507_v3, %v1504_v11 }
 0x28f   : > { %v1509_v19 = vsub.f32 %v1506_v31, %v1508_v42  ;;  %v1545_v42 = vld [vmem:[%s3671_s4 + $0x78] sm:$0xff] }
 0x291   : > { %v1510_v37 = vmul.f32 256.0, %v1509_v19 }
 0x293   : > { %v1511_v63 = vadd.f32 %v1510_v37, %v1505_v61 }
 0x295   : > { %v1512_v32 = vmul.f32 0.001953125, %v1511_v63  ;;  %v1546_v63 = vld [vmem:[%s3671_s4 + $0x80] sm:$0xff] }
 0x297   : > { %v1513_v40 = vmax.f32 %v1512_v32, 0.0 }
 0x299   : > { %v1514_v36 = vadd.f32 1e-05, %v1513_v40 }
 0x29b   : > { %2071 = vrsqrt.f32 %v1514_v36  ;;  %vm1521_vm12 = vweird.f32 %v1514_v36 }
 0x2a1   : > { %v2072_v1 = vpop.eup %2071 }
 0x2a2   : > { %v1516_v57 = vmul.f32 %v2072_v1, %v1514_v36  ;;  %vm1522_vm13 = vweird.f32 %v2072_v1 }
 0x2a3   : > { %vm1523_vm14 = vmor %vm1521_vm12, %vm1522_vm13 }
 0x2a4   : > { %v1517_v50 = vmul.f32 %v2072_v1, %v1516_v57 }
 0x2a6   : > { %v1518_v34 = vmul.f32 0.5, %v1517_v50 }
 0x2a8   : > { %v1519_v54 = vsub.f32 1.5, %v1518_v34 }
 0x2aa   : > { %v1520_v46 = vmul.f32 %v2072_v1, %v1519_v54  ;;  %v1548_v54 = vld [vmem:[%s3671_s4 + $0x90] sm:$0xff] }
 0x2ac   : > { %v1524_v15 = vsel %vm1523_vm14, %v2072_v1, %v1520_v46  ;;  %v1547_v1 = vld [vmem:[%s3671_s4 + $0x88] sm:$0xff] }
 0x2ad   : > { %v1526_v53 = vmul.f32 %v1525_v29, %v1524_v15 }
 0x2af   : > { %v1528_v13 = vmul.f32 %v1526_v53, %v1504_v11  ;;  %v3084_v4 = vperm.slane %v1526_v53, 0  ;;  %v1549_v53 = vld [vmem:[%s3671_s4 + $0x98] sm:$0xff] }
 0x2b1   : > { %v1529_v52 = vsub.f32 %v1527_v18, %v1528_v13  ;;  %v1597_v20 = vmul.f32 %v3084_v4, %v1530_v39  ;;  %v1598_v14 = vmul.f32 %v3084_v4, %v1531_v55  ;;  %v1599_v48 = vmul.f32 %v3084_v4, %v1532_v38  ;;  %v1550_v38 = vld [vmem:[%s3671_s4 + $0xa0] sm:$0xff] }
 0x2b2   : > { %v1600_v10 = vmul.f32 %v3084_v4, %v1533_v51  ;;  %v1601_v56 = vmul.f32 %v3084_v4, %v1534_v12  ;;  %v1602_v9 = vmul.f32 %v3084_v4, %v1535_v60  ;;  %v1603_v27 = vmul.f32 %v3084_v4, %v1536_v0  ;;  %v1551_v60 = vld [vmem:[%s3671_s4 + $0xa8] sm:$0xff] }
 0x2b3   : > { %v3110_v7 = vperm.slane %v1529_v52, 0  ;;  %v1604_v44 = vmul.f32 %v3084_v4, %v1537_v59  ;;  %v1605_v23 = vmul.f32 %v3084_v4, %v1538_v47  ;;  %v1606_v24 = vmul.f32 %v3084_v4, %v1539_v2  ;;  %v1554_v2 = vld [vmem:[%s3671_s4 + $0xc0] sm:$0xff] }
 0x2b4   : > { %v1607_v43 = vmul.f32 %v3084_v4, %v1540_v22  ;;  %v1608_v16 = vmul.f32 %v3084_v4, %v1541_v17  ;;  %v1609_v31 = vmul.f32 %v3084_v4, %v1542_v26  ;;  %v1610_v37 = vmul.f32 %v3084_v4, %v1543_v8  ;;  %v1556_v17 = vld [vmem:[%s3671_s4 + $0xd0] sm:$0xff] }
 0x2b5   : > { %v1664_v33 = vadd.f32 %v3110_v7, %v1597_v20  ;;  %v1665_v49 = vadd.f32 %v3110_v7, %v1598_v14  ;;  %v1666_v30 = vadd.f32 %v3110_v7, %v1599_v48  ;;  %v1667_v58 = vadd.f32 %v3110_v7, %v1600_v10  ;;  %v1552_v14 = vld [vmem:[%s3671_s4 + $0xb0] sm:$0xff]  ;;  %v1553_v10 = vld [vmem:[%s3671_s4 + $0xb8] sm:$0xff] }
 0x2b6   : > { %v1668_v45 = vadd.f32 %v3110_v7, %v1601_v56  ;;  %v1669_v5 = vadd.f32 %v3110_v7, %v1602_v9  ;;  %v1670_v41 = vadd.f32 %v3110_v7, %v1603_v27  ;;  %v1671_v35 = vadd.f32 %v3110_v7, %v1604_v44 }
 0x2b7   : > { %v1728_v28 = vmax.f32 %v1664_v33, 0.0  ;;  %v1729_v21 = vmax.f32 %v1665_v49, 0.0  ;;  %v1730_v25 = vmax.f32 %v1666_v30, 0.0  ;;  %v1731_v62 = vmax.f32 %v1667_v58, 0.0  ;;  %v1555_v33 = vld [vmem:[%s3671_s4 + $0xc8] sm:$0xff] }
 0x2b8   : > { %v1732_v11 = vmax.f32 %v1668_v45, 0.0  ;;  %v1672_v3 = vadd.f32 %v3110_v7, %v1605_v23  ;;  %v1733_v19 = vmax.f32 %v1669_v5, 0.0  ;;  %v1673_v61 = vadd.f32 %v3110_v7, %v1606_v24 }
 0x2b9   : > { %1792 = vst.msk [vmem:[%s3671_s4] sm:$0xff] %vm969_vm2, %v1728_v28  ;;  %v1734_v32 = vmax.f32 %v1670_v41, 0.0  ;;  %v1674_v40 = vadd.f32 %v3110_v7, %v1607_v43  ;;  %v1611_v36 = vmul.f32 %v3084_v4, %v1544_v6  ;;  %v1735_v57 = vmax.f32 %v1671_v35, 0.0  ;;  %v1557_v43 = vld [vmem:[%s3671_s4 + $0xd8] sm:$0xff]  ;;  %v1559_v35 = vld [vmem:[%s3671_s4 + $0xe8] sm:$0xff] }
 0x2ba   : > { %1793 = vst.msk [vmem:[%s3671_s4 + $0x8] sm:$0xff] %vm969_vm2, %v1729_v21  ;;  %v1675_v50 = vadd.f32 %v3110_v7, %v1608_v16  ;;  %v1612_v34 = vmul.f32 %v3084_v4, %v1545_v42  ;;  %v1736_v46 = vmax.f32 %v1672_v3, 0.0  ;;  %v1676_v29 = vadd.f32 %v3110_v7, %v1609_v31  ;;  %v1560_v3 = vld [vmem:[%s3671_s4 + $0xf0] sm:$0xff] }
 0x2bb   : > { %1794 = vst.msk [vmem:[%s3671_s4 + $0x10] sm:$0xff] %vm969_vm2, %v1730_v25  ;;  %v1613_v15 = vmul.f32 %v3084_v4, %v1546_v63  ;;  %v1737_v18 = vmax.f32 %v1673_v61, 0.0  ;;  %v1677_v39 = vadd.f32 %v3110_v7, %v1610_v37  ;;  %v1614_v55 = vmul.f32 %v3084_v4, %v1547_v1  ;;  %v1558_v25 = vld [vmem:[%s3671_s4 + $0xe0] sm:$0xff]  ;;  %v1561_v61 = vld [vmem:[%s3671_s4 + $0xf8] sm:$0xff] }
 0x2bc   : > { %1795 = vst.msk [vmem:[%s3671_s4 + $0x18] sm:$0xff] %vm969_vm2, %v1731_v62  ;;  %v1738_v13 = vmax.f32 %v1674_v40, 0.0  ;;  %v1678_v51 = vadd.f32 %v3110_v7, %v1611_v36  ;;  %v1615_v12 = vmul.f32 %v3084_v4, %v1548_v54  ;;  %v1739_v0 = vmax.f32 %v1675_v50, 0.0  ;;  %v1562_v40 = vld [vmem:[%s3671_s4 + $0x100] sm:$0xff]  ;;  %v1563_v50 = vld [vmem:[%s3671_s4 + $0x108] sm:$0xff] }
 0x2bd   : > { %1796 = vst.msk [vmem:[%s3671_s4 + $0x20] sm:$0xff] %vm969_vm2, %v1732_v11  ;;  %v1679_v52 = vadd.f32 %v3110_v7, %v1612_v34  ;;  %v1616_v20 = vmul.f32 %v3084_v4, %v1549_v53  ;;  %v1740_v48 = vmax.f32 %v1676_v29, 0.0  ;;  %v1680_v59 = vadd.f32 %v3110_v7, %v1613_v15  ;;  %v1564_v29 = vld [vmem:[%s3671_s4 + $0x110] sm:$0xff] }
 0x2be   : > { %1797 = vst.msk [vmem:[%s3671_s4 + $0x28] sm:$0xff] %vm969_vm2, %v1733_v19  ;;  %v1617_v47 = vmul.f32 %v3084_v4, %v1550_v38  ;;  %v1741_v56 = vmax.f32 %v1677_v39, 0.0  ;;  %v1681_v9 = vadd.f32 %v3110_v7, %v1614_v55  ;;  %v1618_v27 = vmul.f32 %v3084_v4, %v1551_v60  ;;  %v1565_v39 = vld [vmem:[%s3671_s4 + $0x118] sm:$0xff] }
 0x2bf   : > { %1798 = vst.msk [vmem:[%s3671_s4 + $0x30] sm:$0xff] %vm969_vm2, %v1734_v32  ;;  %v1742_v22 = vmax.f32 %v1678_v51, 0.0  ;;  %v1682_v44 = vadd.f32 %v3110_v7, %v1615_v12  ;;  %v1619_v23 = vmul.f32 %v3084_v4, %v1552_v14  ;;  %v1743_v49 = vmax.f32 %v1679_v52, 0.0  ;;  %v1566_v51 = vld [vmem:[%s3671_s4 + $0x120] sm:$0xff]  ;;  %v1567_v52 = vld [vmem:[%s3671_s4 + $0x128] sm:$0xff] }
 0x2c0   : > { %1799 = vst.msk [vmem:[%s3671_s4 + $0x38] sm:$0xff] %vm969_vm2, %v1735_v57  ;;  %v1683_v30 = vadd.f32 %v3110_v7, %v1616_v20  ;;  %v1620_v58 = vmul.f32 %v3084_v4, %v1553_v10  ;;  %v1744_v45 = vmax.f32 %v1680_v59, 0.0  ;;  %v1684_v5 = vadd.f32 %v3110_v7, %v1617_v47  ;;  %v1568_v59 = vld [vmem:[%s3671_s4 + $0x130] sm:$0xff] }
 0x2c1   : > { %1800 = vst.msk [vmem:[%s3671_s4 + $0x40] sm:$0xff] %vm969_vm2, %v1736_v46  ;;  %v1621_v24 = vmul.f32 %v3084_v4, %v1554_v2  ;;  %v1745_v26 = vmax.f32 %v1681_v9, 0.0  ;;  %v1685_v28 = vadd.f32 %v3110_v7, %v1618_v27  ;;  %v1622_v21 = vmul.f32 %v3084_v4, %v1555_v33  ;;  %v1569_v9 = vld [vmem:[%s3671_s4 + $0x138] sm:$0xff] }
 0x2c2   : > { %1801 = vst.msk [vmem:[%s3671_s4 + $0x48] sm:$0xff] %vm969_vm2, %v1737_v18  ;;  %v1746_v41 = vmax.f32 %v1682_v44, 0.0  ;;  %v1686_v8 = vadd.f32 %v3110_v7, %v1619_v23  ;;  %v1623_v62 = vmul.f32 %v3084_v4, %v1556_v17  ;;  %v1747_v16 = vmax.f32 %v1683_v30, 0.0  ;;  %v1570_v44 = vld [vmem:[%s3671_s4 + $0x140] sm:$0xff]  ;;  %v1571_v30 = vld [vmem:[%s3671_s4 + $0x148] sm:$0xff] }
 0x2c3   : > { %1802 = vst.msk [vmem:[%s3671_s4 + $0x50] sm:$0xff] %vm969_vm2, %v1738_v13  ;;  %v1687_v6 = vadd.f32 %v3110_v7, %v1620_v58  ;;  %v1624_v11 = vmul.f32 %v3084_v4, %v1557_v43  ;;  %v1748_v31 = vmax.f32 %v1684_v5, 0.0  ;;  %v1688_v42 = vadd.f32 %v3110_v7, %v1621_v24  ;;  %v1572_v5 = vld [vmem:[%s3671_s4 + $0x150] sm:$0xff] }
 0x2c4   : > { %1803 = vst.msk [vmem:[%s3671_s4 + $0x58] sm:$0xff] %vm969_vm2, %v1739_v0  ;;  %v1625_v19 = vmul.f32 %v3084_v4, %v1558_v25  ;;  %v1749_v37 = vmax.f32 %v1685_v28, 0.0  ;;  %v1689_v63 = vadd.f32 %v3110_v7, %v1622_v21  ;;  %v1626_v32 = vmul.f32 %v3084_v4, %v1559_v35  ;;  %v1573_v28 = vld [vmem:[%s3671_s4 + $0x158] sm:$0xff] }
 0x2c5   : > { %1804 = vst.msk [vmem:[%s3671_s4 + $0x60] sm:$0xff] %vm969_vm2, %v1740_v48  ;;  %v1750_v36 = vmax.f32 %v1686_v8, 0.0  ;;  %v1690_v1 = vadd.f32 %v3110_v7, %v1623_v62  ;;  %v1627_v57 = vmul.f32 %v3084_v4, %v1560_v3  ;;  %v1751_v34 = vmax.f32 %v1687_v6, 0.0  ;;  %v1574_v8 = vld [vmem:[%s3671_s4 + $0x160] sm:$0xff]  ;;  %v1575_v6 = vld [vmem:[%s3671_s4 + $0x168] sm:$0xff] }
 0x2c6   : > { %1805 = vst.msk [vmem:[%s3671_s4 + $0x68] sm:$0xff] %vm969_vm2, %v1741_v56  ;;  %v1691_v54 = vadd.f32 %v3110_v7, %v1624_v11  ;;  %v1628_v46 = vmul.f32 %v3084_v4, %v1561_v61  ;;  %v1752_v15 = vmax.f32 %v1688_v42, 0.0  ;;  %v1692_v53 = vadd.f32 %v3110_v7, %v1625_v19  ;;  %v1576_v42 = vld [vmem:[%s3671_s4 + $0x170] sm:$0xff] }
 0x2c7   : > { %1806 = vst.msk [vmem:[%s3671_s4 + $0x70] sm:$0xff] %vm969_vm2, %v1742_v22  ;;  %v1629_v18 = vmul.f32 %v3084_v4, %v1562_v40  ;;  %v1753_v55 = vmax.f32 %v1689_v63, 0.0  ;;  %v1693_v38 = vadd.f32 %v3110_v7, %v1626_v32  ;;  %v1630_v13 = vmul.f32 %v3084_v4, %v1563_v50  ;;  %v1577_v63 = vld [vmem:[%s3671_s4 + $0x178] sm:$0xff] }
 0x2c8   : > { %1807 = vst.msk [vmem:[%s3671_s4 + $0x78] sm:$0xff] %vm969_vm2, %v1743_v49  ;;  %v1754_v12 = vmax.f32 %v1690_v1, 0.0  ;;  %v1694_v60 = vadd.f32 %v3110_v7, %v1627_v57  ;;  %v1631_v0 = vmul.f32 %v3084_v4, %v1564_v29  ;;  %v1755_v20 = vmax.f32 %v1691_v54, 0.0  ;;  %v1578_v1 = vld [vmem:[%s3671_s4 + $0x180] sm:$0xff]  ;;  %v1579_v54 = vld [vmem:[%s3671_s4 + $0x188] sm:$0xff] }
 0x2c9   : > { %1808 = vst.msk [vmem:[%s3671_s4 + $0x80] sm:$0xff] %vm969_vm2, %v1744_v45  ;;  %v1695_v14 = vadd.f32 %v3110_v7, %v1628_v46  ;;  %v1632_v48 = vmul.f32 %v3084_v4, %v1565_v39  ;;  %v1756_v47 = vmax.f32 %v1692_v53, 0.0  ;;  %v1696_v10 = vadd.f32 %v3110_v7, %v1629_v18  ;;  %v1593_v46 = vld [vmem:[%s3671_s4 + $0x1f8] sm:$0xff]  ;;  %v1580_v18 = vld [vmem:[%s3671_s4 + $0x190] sm:$0xff] }
 0x2ca   : > { %1809 = vst.msk [vmem:[%s3671_s4 + $0x88] sm:$0xff] %vm969_vm2, %v1745_v26  ;;  %v1633_v56 = vmul.f32 %v3084_v4, %v1566_v51  ;;  %v1757_v27 = vmax.f32 %v1693_v38, 0.0  ;;  %v1697_v2 = vadd.f32 %v3110_v7, %v1630_v13  ;;  %v1634_v22 = vmul.f32 %v3084_v4, %v1567_v52  ;;  %v1581_v13 = vld [vmem:[%s3671_s4 + $0x198] sm:$0xff] }
 0x2cb   : > { %1810 = vst.msk [vmem:[%s3671_s4 + $0x90] sm:$0xff] %vm969_vm2, %v1746_v41  ;;  %v1758_v23 = vmax.f32 %v1694_v60, 0.0  ;;  %v1698_v33 = vadd.f32 %v3110_v7, %v1631_v0  ;;  %v1635_v49 = vmul.f32 %v3084_v4, %v1568_v59  ;;  %v1759_v58 = vmax.f32 %v1695_v14, 0.0  ;;  %v1582_v0 = vld [vmem:[%s3671_s4 + $0x1a0] sm:$0xff]  ;;  %v1583_v59 = vld [vmem:[%s3671_s4 + $0x1a8] sm:$0xff] }
 0x2cc   : > { %1811 = vst.msk [vmem:[%s3671_s4 + $0x98] sm:$0xff] %vm969_vm2, %v1747_v16  ;;  %v1699_v17 = vadd.f32 %v3110_v7, %v1632_v48  ;;  %v1636_v45 = vmul.f32 %v3084_v4, %v1569_v9  ;;  %v1760_v24 = vmax.f32 %v1696_v10, 0.0  ;;  %v1700_v43 = vadd.f32 %v3110_v7, %v1633_v56  ;;  %v1584_v9 = vld [vmem:[%s3671_s4 + $0x1b0] sm:$0xff] }
 0x2cd   : > { %1812 = vst.msk [vmem:[%s3671_s4 + $0xa0] sm:$0xff] %vm969_vm2, %v1748_v31  ;;  %v1637_v26 = vmul.f32 %v3084_v4, %v1570_v44  ;;  %v1761_v21 = vmax.f32 %v1697_v2, 0.0  ;;  %v1701_v25 = vadd.f32 %v3110_v7, %v1634_v22  ;;  %v1638_v41 = vmul.f32 %v3084_v4, %v1571_v30 }
 0x2ce   : > { %1813 = vst.msk [vmem:[%s3671_s4 + $0xa8] sm:$0xff] %vm969_vm2, %v1749_v37  ;;  %v1762_v62 = vmax.f32 %v1698_v33, 0.0  ;;  %v1702_v35 = vadd.f32 %v3110_v7, %v1635_v49  ;;  %v1639_v16 = vmul.f32 %v3084_v4, %v1572_v5  ;;  %v1763_v11 = vmax.f32 %v1699_v17, 0.0 }
 0x2cf   : > { %1814 = vst.msk [vmem:[%s3671_s4 + $0xb0] sm:$0xff] %vm969_vm2, %v1750_v36  ;;  %v1703_v3 = vadd.f32 %v3110_v7, %v1636_v45  ;;  %v1640_v31 = vmul.f32 %v3084_v4, %v1573_v28  ;;  %v1764_v19 = vmax.f32 %v1700_v43, 0.0  ;;  %v1704_v61 = vadd.f32 %v3110_v7, %v1637_v26 }
 0x2d0   : > { %1815 = vst.msk [vmem:[%s3671_s4 + $0xb8] sm:$0xff] %vm969_vm2, %v1751_v34  ;;  %v1641_v37 = vmul.f32 %v3084_v4, %v1574_v8  ;;  %v1765_v32 = vmax.f32 %v1701_v25, 0.0  ;;  %v1705_v40 = vadd.f32 %v3110_v7, %v1638_v41  ;;  %v1642_v36 = vmul.f32 %v3084_v4, %v1575_v6 }
 0x2d1   : > { %1816 = vst.msk [vmem:[%s3671_s4 + $0xc0] sm:$0xff] %vm969_vm2, %v1752_v15  ;;  %v1766_v57 = vmax.f32 %v1702_v35, 0.0  ;;  %v1706_v50 = vadd.f32 %v3110_v7, %v1639_v16  ;;  %v1643_v34 = vmul.f32 %v3084_v4, %v1576_v42  ;;  %v1767_v29 = vmax.f32 %v1703_v3, 0.0 }
 0x2d2   : > { %1817 = vst.msk [vmem:[%s3671_s4 + $0xc8] sm:$0xff] %vm969_vm2, %v1753_v55  ;;  %v1707_v15 = vadd.f32 %v3110_v7, %v1640_v31  ;;  %v1644_v53 = vmul.f32 %v3084_v4, %v1577_v63  ;;  %v1768_v39 = vmax.f32 %v1704_v61, 0.0  ;;  %v1708_v55 = vadd.f32 %v3110_v7, %v1641_v37 }
 0x2d3   : > { %1818 = vst.msk [vmem:[%s3671_s4 + $0xd0] sm:$0xff] %vm969_vm2, %v1754_v12  ;;  %v1645_v38 = vmul.f32 %v3084_v4, %v1578_v1  ;;  %v1769_v51 = vmax.f32 %v1705_v40, 0.0  ;;  %v1709_v12 = vadd.f32 %v3110_v7, %v1642_v36  ;;  %v1646_v60 = vmul.f32 %v3084_v4, %v1579_v54 }
 0x2d4   : > { %1819 = vst.msk [vmem:[%s3671_s4 + $0xd8] sm:$0xff] %vm969_vm2, %v1755_v20  ;;  %v1660_v52 = vmul.f32 %v3084_v4, %v1593_v46  ;;  %v1770_v20 = vmax.f32 %v1706_v50, 0.0  ;;  %v1710_v14 = vadd.f32 %v3110_v7, %v1643_v34  ;;  %v1647_v48 = vmul.f32 %v3084_v4, %v1580_v18 }
 0x2d5   : > { %1820 = vst.msk [vmem:[%s3671_s4 + $0xe0] sm:$0xff] %vm969_vm2, %v1756_v47  ;;  %v1771_v47 = vmax.f32 %v1707_v15, 0.0  ;;  %v1711_v10 = vadd.f32 %v3110_v7, %v1644_v53  ;;  %v1648_v56 = vmul.f32 %v3084_v4, %v1581_v13  ;;  %v1772_v2 = vmax.f32 %v1708_v55, 0.0 }
 0x2d6   : > { %1821 = vst.msk [vmem:[%s3671_s4 + $0xe8] sm:$0xff] %vm969_vm2, %v1757_v27  ;;  %v3509_v27 = vadd.f32 %v3110_v7, %v1660_v52  ;;  %v1712_v22 = vadd.f32 %v3110_v7, %v1645_v38  ;;  %v1649_v44 = vmul.f32 %v3084_v4, %v1582_v0  ;;  %v1773_v33 = vmax.f32 %v1709_v12, 0.0 }
 0x2d7   : > { %1822 = vst.msk [vmem:[%s3671_s4 + $0xf0] sm:$0xff] %vm969_vm2, %v1758_v23  ;;  %v1585_v23 = vld [vmem:[%s3671_s4 + $0x1b8] sm:$0xff]  ;;  %v1713_v49 = vadd.f32 %v3110_v7, %v1646_v60  ;;  %v1650_v30 = vmul.f32 %v3084_v4, %v1583_v59  ;;  %v1774_v17 = vmax.f32 %v1710_v14, 0.0  ;;  %v1714_v45 = vadd.f32 %v3110_v7, %v1647_v48 }
 0x2d8   : > { %1823 = vst.msk [vmem:[%s3671_s4 + $0xf8] sm:$0xff] %vm969_vm2, %v1759_v58  ;;  %v1586_v58 = vld [vmem:[%s3671_s4 + $0x1c0] sm:$0xff]  ;;  %v1651_v5 = vmul.f32 %v3084_v4, %v1584_v9  ;;  %v1775_v43 = vmax.f32 %v1711_v10, 0.0  ;;  %v1715_v26 = vadd.f32 %v3110_v7, %v1648_v56  ;;  %v1652_v28 = vmul.f32 %v3084_v4, %v1585_v23 }
 0x2d9   : > { %1824 = vst.msk [vmem:[%s3671_s4 + $0x100] sm:$0xff] %vm969_vm2, %v1760_v24  ;;  %v1587_v24 = vld [vmem:[%s3671_s4 + $0x1c8] sm:$0xff]  ;;  %v1776_v25 = vmax.f32 %v1712_v22, 0.0  ;;  %v1716_v41 = vadd.f32 %v3110_v7, %v1649_v44  ;;  %v1653_v8 = vmul.f32 %v3084_v4, %v1586_v58  ;;  %v1777_v35 = vmax.f32 %v1713_v49, 0.0 }
 0x2da   : > { %1825 = vst.msk [vmem:[%s3671_s4 + $0x108] sm:$0xff] %vm969_vm2, %v1761_v21  ;;  %v1588_v21 = vld [vmem:[%s3671_s4 + $0x1d0] sm:$0xff]  ;;  %v1717_v16 = vadd.f32 %v3110_v7, %v1650_v30  ;;  %v1654_v6 = vmul.f32 %v3084_v4, %v1587_v24  ;;  %v1778_v3 = vmax.f32 %v1714_v45, 0.0  ;;  %v1718_v31 = vadd.f32 %v3110_v7, %v1651_v5 }
 0x2db   : > { %1826 = vst.msk [vmem:[%s3671_s4 + $0x110] sm:$0xff] %vm969_vm2, %v1762_v62  ;;  %v1589_v62 = vld [vmem:[%s3671_s4 + $0x1d8] sm:$0xff]  ;;  %v1655_v42 = vmul.f32 %v3084_v4, %v1588_v21  ;;  %v1779_v61 = vmax.f32 %v1715_v26, 0.0  ;;  %v1719_v37 = vadd.f32 %v3110_v7, %v1652_v28  ;;  %v1780_v40 = vmax.f32 %v1716_v41, 0.0 }
 0x2dc   : > { %1827 = vst.msk [vmem:[%s3671_s4 + $0x118] sm:$0xff] %vm969_vm2, %v1763_v11  ;;  %v1590_v11 = vld [vmem:[%s3671_s4 + $0x1e0] sm:$0xff]  ;;  %v1656_v63 = vmul.f32 %v3084_v4, %v1589_v62  ;;  %v1720_v36 = vadd.f32 %v3110_v7, %v1653_v8  ;;  %v1721_v50 = vadd.f32 %v3110_v7, %v1654_v6  ;;  %v1782_v54 = vmax.f32 %v1718_v31, 0.0 }
 0x2dd   : > { %1828 = vst.msk [vmem:[%s3671_s4 + $0x120] sm:$0xff] %vm969_vm2, %v1764_v19  ;;  %v1591_v19 = vld [vmem:[%s3671_s4 + $0x1e8] sm:$0xff]  ;;  %v1657_v1 = vmul.f32 %v3084_v4, %v1590_v11  ;;  %v1722_v46 = vadd.f32 %v3110_v7, %v1655_v42  ;;  %v1783_v15 = vmax.f32 %v1719_v37, 0.0  ;;  %v1791_v0 = vmax.f32 %v3509_v27, 0.0 }
 0x2de   : > { %1829 = vst.msk [vmem:[%s3671_s4 + $0x128] sm:$0xff] %vm969_vm2, %v1765_v32  ;;  %v1592_v32 = vld [vmem:[%s3671_s4 + $0x1f0] sm:$0xff]  ;;  %v1658_v34 = vmul.f32 %v3084_v4, %v1591_v19  ;;  %v1723_v53 = vadd.f32 %v3110_v7, %v1656_v63  ;;  %v1784_v18 = vmax.f32 %v1720_v36, 0.0 }
 0x2df   : > { %1830 = vst.msk [vmem:[%s3671_s4 + $0x130] sm:$0xff] %vm969_vm2, %v1766_v57  ;;  %v1781_v57 = vmax.f32 %v1717_v16, 0.0  ;;  %v1786_v38 = vmax.f32 %v1722_v46, 0.0 }
 0x2e0   : > { %1831 = vst.msk [vmem:[%s3671_s4 + $0x138] sm:$0xff] %vm969_vm2, %v1767_v29  ;;  %v1659_v29 = vmul.f32 %v3084_v4, %v1592_v32  ;;  %v1785_v4 = vmax.f32 %v1721_v50, 0.0  ;;  %v1725_v55 = vadd.f32 %v3110_v7, %v1658_v34 }
 0x2e1   : > { %1832 = vst.msk [vmem:[%s3671_s4 + $0x140] sm:$0xff] %vm969_vm2, %v1768_v39  ;;  %v1724_v39 = vadd.f32 %v3110_v7, %v1657_v1 }
 0x2e2   : > { %1833 = vst.msk [vmem:[%s3671_s4 + $0x148] sm:$0xff] %vm969_vm2, %v1769_v51  ;;  %v1726_v13 = vadd.f32 %v3110_v7, %v1659_v29  ;;  %v1787_v51 = vmax.f32 %v1723_v53, 0.0  ;;  %v1789_v60 = vmax.f32 %v1725_v55, 0.0 }
 0x2e3   : > { %1834 = vst.msk [vmem:[%s3671_s4 + $0x150] sm:$0xff] %vm969_vm2, %v1770_v20  ;;  %v1788_v12 = vmax.f32 %v1724_v39, 0.0 }
 0x2e4   : > { %1835 = vst.msk [vmem:[%s3671_s4 + $0x158] sm:$0xff] %vm969_vm2, %v1771_v47  ;;  %v1790_v7 = vmax.f32 %v1726_v13, 0.0 }
 0x2e5   : > { %1836 = vst.msk [vmem:[%s3671_s4 + $0x160] sm:$0xff] %vm969_vm2, %v1772_v2 }
 0x2e6   : > { %1837 = vst.msk [vmem:[%s3671_s4 + $0x168] sm:$0xff] %vm969_vm2, %v1773_v33 }
 0x2e7   : > { %1838 = vst.msk [vmem:[%s3671_s4 + $0x170] sm:$0xff] %vm969_vm2, %v1774_v17 }
 0x2e8   : > { %1839 = vst.msk [vmem:[%s3671_s4 + $0x178] sm:$0xff] %vm969_vm2, %v1775_v43 }
 0x2e9   : > { %1840 = vst.msk [vmem:[%s3671_s4 + $0x180] sm:$0xff] %vm969_vm2, %v1776_v25 }
 0x2ea   : > { %1841 = vst.msk [vmem:[%s3671_s4 + $0x188] sm:$0xff] %vm969_vm2, %v1777_v35 }
 0x2eb   : > { %1842 = vst.msk [vmem:[%s3671_s4 + $0x190] sm:$0xff] %vm969_vm2, %v1778_v3 }
 0x2ec   : > { %1843 = vst.msk [vmem:[%s3671_s4 + $0x198] sm:$0xff] %vm969_vm2, %v1779_v61 }
 0x2ed   : > { %1844 = vst.msk [vmem:[%s3671_s4 + $0x1a0] sm:$0xff] %vm969_vm2, %v1780_v40 }
 0x2ee   : > { %1845 = vst.msk [vmem:[%s3671_s4 + $0x1a8] sm:$0xff] %vm969_vm2, %v1781_v57 }
 0x2ef   : > { %1846 = vst.msk [vmem:[%s3671_s4 + $0x1b0] sm:$0xff] %vm969_vm2, %v1782_v54 }
 0x2f0   : > { %1847 = vst.msk [vmem:[%s3671_s4 + $0x1b8] sm:$0xff] %vm969_vm2, %v1783_v15 }
 0x2f1   : > { %1848 = vst.msk [vmem:[%s3671_s4 + $0x1c0] sm:$0xff] %vm969_vm2, %v1784_v18 }
 0x2f2   : > { %1849 = vst.msk [vmem:[%s3671_s4 + $0x1c8] sm:$0xff] %vm969_vm2, %v1785_v4 }
 0x2f3   : > { %1850 = vst.msk [vmem:[%s3671_s4 + $0x1d0] sm:$0xff] %vm969_vm2, %v1786_v38 }
 0x2f4   : > { %1851 = vst.msk [vmem:[%s3671_s4 + $0x1d8] sm:$0xff] %vm969_vm2, %v1787_v51 }
 0x2f5   : > { %1852 = vst.msk [vmem:[%s3671_s4 + $0x1e0] sm:$0xff] %vm969_vm2, %v1788_v12 }
 0x2f6   : > { %1853 = vst.msk [vmem:[%s3671_s4 + $0x1e8] sm:$0xff] %vm969_vm2, %v1789_v60 }
 0x2f7   : > { %1854 = vst.msk [vmem:[%s3671_s4 + $0x1f0] sm:$0xff] %vm969_vm2, %v1790_v7 }
 0x2f8   : > { %1855 = vst.msk [vmem:[%s3671_s4 + $0x1f8] sm:$0xff] %vm969_vm2, %v1791_v0 }
 0x2f9 PF: > { %s14_s17 = sadd.s32 1, %s2095_s17   ;;  %s3672_s15 = smov %s2091_s16 }
 0x2fa   : > { %p11_p7 = scmp.ge.s32.totalorder %s14_s17, 4   ;;  %s3673_s16 = smov %s3675_s18 }
 0x2fc   :  { %13 = sbr.rel (!%p11_p7) target bundleno = 2 (0x2), region = 72 }

</bundles_post_ra>
